<compile_context>
chip_gen: v5e
topology: v5e:2x2
jax: 0.10.0
libtpu: 0.0.40
codegen_flags: <defaults>
</compile_context>

<pallas_src>
import functools

import jax
import jax.numpy as jnp
import numpy as np
from jax import lax
from jax.experimental import pallas as pl
from jax.experimental.pallas import tpu as pltpu


def _round_up(x, m):
    return ((x + m - 1) // m) * m


def _pad_last(a, target):
    d = target - a.shape[-1]
    if d == 0:
        return a
    return jnp.pad(a, [(0, 0)] * (a.ndim - 1) + [(0, d)])


# ---------------------------------------------------------------------------
# Fused MBConv kernel: one (batch, row-tile) grid step produces a
# (row_tile, Wo, Cout_p) output slab; the expanded HID activation lives in VMEM.
# ---------------------------------------------------------------------------
def _mbconv_fused_kernel(x_ref, vm_ref, we_ref, s1_ref, b1_ref, wd_ref, s2_ref,
                         b2_ref, wpj_ref, s3_ref, b3_ref, *rest,
                         K, s, th, Mr, Wo, use_residual):
    if use_residual:
        idn_ref, o_ref = rest
    else:
        (o_ref,) = rest

    Wph = x_ref.shape[4]
    Cin = x_ref.shape[5]
    HID_p = we_ref.shape[1]
    Cout_p = wpj_ref.shape[1]

    row0 = pl.program_id(1) * th          # first phase-local input row of this tile

    we = we_ref[...]                      # (Cin, HID_p)
    s1 = s1_ref[...]                      # (1, HID_p)
    b1 = b1_ref[...]
    wd = wd_ref[...]                      # (K, K, HID_p)

    acc = jnp.zeros((th, Wo, HID_p), jnp.float32)

    # --- expand (1x1 matmul + BN + ReLU6) per stride-phase, then accumulate the
    #     depthwise taps for that phase straight out of VMEM ---------------------
    for rp in range(s):                   # row phase
        for wp in range(s):               # col phase
            xin = x_ref[0, rp, wp, pl.ds(row0, Mr), :, :]       # (Mr, Wph, Cin)
            vm = vm_ref[rp, wp, pl.ds(row0, Mr), :, :]          # (Mr, Wph, 1)
            e = jnp.dot(xin.reshape(Mr * Wph, Cin), we,
                        preferred_element_type=jnp.float32)
            e = jnp.clip(e * s1 + b1, 0.0, 6.0).reshape(Mr, Wph, HID_p)
            # re-zero the spatial zero-padding: expand(0) = relu6(b1) != 0
            e = e * vm

            for qw in range((K - 1 - wp) // s + 1):
                cols = e[:, qw:qw + Wo, :]                      # (Mr, Wo, HID_p)
                for qh in range((K - 1 - rp) // s + 1):
                    acc = acc + (cols[qh:qh + th, :, :]
                                 * wd[qh * s + rp, qw * s + wp, :])

    # --- depthwise epilogue: BN + ReLU6 -----------------------------------------
    z = jnp.clip(acc * s2_ref[...] + b2_ref[...], 0.0, 6.0)     # (th, Wo, HID_p)

    # --- project (1x1 matmul + BN [+ residual]), lane-dense store ----------------
    y = jnp.dot(z.reshape(th * Wo, HID_p), wpj_ref[...],
                preferred_element_type=jnp.float32)
    y = (y * s3_ref[...] + b3_ref[...]).reshape(th, Wo, Cout_p)
    if use_residual:
        y = y + idn_ref[0]
    o_ref[0] = y.astype(o_ref.dtype)


# ---------------------------------------------------------------------------
# MBConv forward (NCHW in / NCHW out, like the PyTorch module)
# ---------------------------------------------------------------------------
def mbconv_forward(x_nchw, params, *, K, stride, row_tile=8):
    B, Cin, H, W = x_nchw.shape
    HID = params["w_expand"].shape[1]
    Cout = params["w_project"].shape[1]
    s = stride
    pad = (K - 1) // 2
    Ho = (H + 2 * pad - K) // s + 1
    Wo = (W + 2 * pad - K) // s + 1
    use_residual = (s == 1) and (Cin == Cout)

    HID_p = _round_up(HID, 128)
    Cout_p = _round_up(Cout, 128)

    th = min(row_tile, Ho)
    n_tiles = pl.cdiv(Ho, th)
    qmax = (K - 1) // s
    Mr = th + qmax                       # phase-local input rows needed per tile

    # padded + stride-phase-decomposed input (cheap: this is the 1x tensor).
    Hph = max(pl.cdiv(H + 2 * pad, s), n_tiles * th + qmax)
    Wph = _round_up(max(pl.cdiv(W + 2 * pad, s), Wo + qmax), 8)
    Hp, Wp = Hph * s, Wph * s

    x_nhwc = jnp.transpose(x_nchw, (0, 2, 3, 1))
    xp = jnp.pad(x_nhwc, ((0, 0), (pad, Hp - H - pad), (pad, Wp - W - pad), (0, 0)))
    # x_ph[b, rp, wp, m, j, c] == xp[b, m*s + rp, j*s + wp, c]
    x_ph = xp.reshape(B, Hph, s, Wph, s, Cin).transpose(0, 2, 4, 1, 3, 5)

    # validity mask of the spatial zero-padding, phase-decomposed the same way.
    vmask = jnp.pad(jnp.ones((H, W), jnp.float32),
                    ((pad, Hp - H - pad), (pad, Wp - W - pad)))
    vmask = vmask.reshape(Hph, s, Wph, s).transpose(1, 3, 0, 2)[..., None]

    # lane-pad weights / folded-BN params to multiples of 128.
    w_exp = _pad_last(params["w_expand"], HID_p)                       # (Cin, HID_p)
    w_dw = _pad_last(params["w_dw"], HID_p)                            # (K, K, HID_p)
    w_prj = jnp.pad(params["w_project"],
                    ((0, HID_p - HID), (0, Cout_p - Cout)))            # (HID_p, Cout_p)
    s1 = _pad_last(params["s1"], HID_p).reshape(1, HID_p)
    b1 = _pad_last(params["b1"], HID_p).reshape(1, HID_p)
    s2 = _pad_last(params["s2"], HID_p).reshape(1, HID_p)
    b2 = _pad_last(params["b2"], HID_p).reshape(1, HID_p)
    s3 = _pad_last(params["s3"], Cout_p).reshape(1, Cout_p)
    b3 = _pad_last(params["b3"], Cout_p).reshape(1, Cout_p)

    kern = functools.partial(_mbconv_fused_kernel, K=K, s=s, th=th, Mr=Mr,
                             Wo=Wo, use_residual=use_residual)

    in_specs = [
        pl.BlockSpec((1, s, s, Hph, Wph, Cin), lambda b, i: (b, 0, 0, 0, 0, 0)),
        pl.BlockSpec((s, s, Hph, Wph, 1), lambda b, i: (0, 0, 0, 0, 0)),
        pl.BlockSpec((Cin, HID_p), lambda b, i: (0, 0)),
        pl.BlockSpec((1, HID_p), lambda b, i: (0, 0)),
        pl.BlockSpec((1, HID_p), lambda b, i: (0, 0)),
        pl.BlockSpec((K, K, HID_p), lambda b, i: (0, 0, 0)),
        pl.BlockSpec((1, HID_p), lambda b, i: (0, 0)),
        pl.BlockSpec((1, HID_p), lambda b, i: (0, 0)),
        pl.BlockSpec((HID_p, Cout_p), lambda b, i: (0, 0)),
        pl.BlockSpec((1, Cout_p), lambda b, i: (0, 0)),
        pl.BlockSpec((1, Cout_p), lambda b, i: (0, 0)),
    ]
    args = [x_ph, vmask, w_exp, s1, b1, w_dw, s2, b2, w_prj, s3, b3]
    if use_residual:
        idn = _pad_last(x_nhwc, Cout_p)                                # (B, Ho, Wo, Cout_p)
        in_specs.append(pl.BlockSpec((1, th, Wo, Cout_p), lambda b, i: (b, i, 0, 0)))
        args.append(idn)

    out = pl.pallas_call(
        kern,
        out_shape=jax.ShapeDtypeStruct((B, Ho, Wo, Cout_p), x_nchw.dtype),
        grid=(B, n_tiles),
        in_specs=in_specs,
        out_specs=pl.BlockSpec((1, th, Wo, Cout_p), lambda b, i: (b, i, 0, 0)),
        compiler_params=pltpu.CompilerParams(
            dimension_semantics=("parallel", "parallel")),
    )(*args)

    return jnp.transpose(out[..., :Cout], (0, 3, 1, 2))                # back to NCHW


# ---------------------------------------------------------------------------
# Pure-JAX reference (lax conv) for a sanity check
# ---------------------------------------------------------------------------
def ref_forward(x, params, *, K, stride):
    Cin = x.shape[1]
    HID = params["w_expand"].shape[1]
    Cout = params["w_project"].shape[1]
    prec = lax.Precision.HIGHEST

    w1 = params["w_expand"].T.reshape(HID, Cin, 1, 1)
    y = lax.conv_general_dilated(x, w1, (1, 1), "VALID",
                                 dimension_numbers=("NCHW", "OIHW", "NCHW"),
                                 precision=prec)
    y = y * params["s1"][None, :, None, None] + params["b1"][None, :, None, None]
    y = jnp.clip(y, 0.0, 6.0)

    wd = params["w_dw"].transpose(2, 0, 1)[:, None]       # (HID, 1, K, K)
    pad = (K - 1) // 2
    y = lax.conv_general_dilated(y, wd, (stride, stride), [(pad, pad), (pad, pad)],
                                 dimension_numbers=("NCHW", "OIHW", "NCHW"),
                                 feature_group_count=HID, precision=prec)
    y = y * params["s2"][None, :, None, None] + params["b2"][None, :, None, None]
    y = jnp.clip(y, 0.0, 6.0)

    w3 = params["w_project"].T.reshape(Cout, HID, 1, 1)
    z = lax.conv_general_dilated(y, w3, (1, 1), "VALID",
                                 dimension_numbers=("NCHW", "OIHW", "NCHW"),
                                 precision=prec)
    z = z * params["s3"][None, :, None, None] + params["b3"][None, :, None, None]
    if stride == 1 and Cin == Cout:
        z = z + x
    return z


# ---------------------------------------------------------------------------
# Test harness
# ---------------------------------------------------------------------------
def _make_params(key, Cin, Cout, K, expand_ratio, eps=1e-5):
    HID = Cin * expand_ratio
    ks = jax.random.split(key, 6)

    def bn_fold(k, C):
        kg, kb, km, kv = jax.random.split(k, 4)
        gamma = 1.0 + 0.1 * jax.random.normal(kg, (C,), jnp.float32)
        beta = 0.1 * jax.random.normal(kb, (C,), jnp.float32)
        mean = 0.1 * jax.random.normal(km, (C,), jnp.float32)
        var = jnp.abs(jax.random.normal(kv, (C,), jnp.float32)) + 0.5
        scale = gamma / jnp.sqrt(var + eps)
        bias = beta - mean * scale
        return scale, bias

    w_expand = 0.1 * jax.random.normal(ks[0], (Cin, HID), jnp.float32)
    w_dw = 0.1 * jax.random.normal(ks[1], (K, K, HID), jnp.float32)
    w_project = 0.1 * jax.random.normal(ks[2], (HID, Cout), jnp.float32)
    s1, b1 = bn_fold(ks[3], HID)
    s2, b2 = bn_fold(ks[4], HID)
    s3, b3 = bn_fold(ks[5], Cout)
    return dict(w_expand=w_expand, w_dw=w_dw, w_project=w_project,
                s1=s1, b1=b1, s2=s2, b2=b2, s3=s3, b3=b3)


def _run_case(key, *, B, Cin, Cout, K, stride, expand_ratio, H, W, row_tile):
    kp, kx = jax.random.split(key)
    params = _make_params(kp, Cin, Cout, K, expand_ratio)
    x = jax.random.normal(kx, (B, Cin, H, W), jnp.float32)

    fwd = jax.jit(functools.partial(mbconv_forward, K=K, stride=stride,
                                    row_tile=row_tile))
    out = jax.block_until_ready(fwd(x, params))
    ref = jax.block_until_ready(ref_forward(x, params, K=K, stride=stride))
    np.testing.assert_allclose(np.asarray(out), np.asarray(ref),
                               rtol=1e-3, atol=1e-3)
    return out


if __name__ == "__main__":
    key = jax.random.PRNGKey(0)
    k1, k2 = jax.random.split(key)

    # Case 1: scaled-down version of the spec config (stride 2, K=5, expand 6).
    _run_case(k1, B=2, Cin=16, Cout=32, K=5, stride=2, expand_ratio=6,
              H=16, W=16, row_tile=4)

    # Case 2: stride-1 residual path + a partial (masked) last row tile.
    _run_case(k2, B=2, Cin=32, Cout=32, K=3, stride=1, expand_ratio=6,
              H=14, W=16, row_tile=4)

    print("KERNEL_OK")
</pallas_src>

<mosaic_0001>
module attributes {stable_mosaic.version = 11 : i64} {
  func.func @_mbconv_fused_kernel(%arg0: i32, %arg1: i32, %arg2: memref<1x2x2x10x16x16xf32, #tpu.memory_space<vmem>>, %arg3: memref<2x2x10x16x1xf32, #tpu.memory_space<vmem>>, %arg4: memref<16x128xf32, #tpu.memory_space<vmem>>, %arg5: memref<1x128xf32, #tpu.memory_space<vmem>>, %arg6: memref<1x128xf32, #tpu.memory_space<vmem>>, %arg7: memref<5x5x128xf32, #tpu.memory_space<vmem>>, %arg8: memref<1x128xf32, #tpu.memory_space<vmem>>, %arg9: memref<1x128xf32, #tpu.memory_space<vmem>>, %arg10: memref<128x128xf32, #tpu.memory_space<vmem>>, %arg11: memref<1x128xf32, #tpu.memory_space<vmem>>, %arg12: memref<1x128xf32, #tpu.memory_space<vmem>>, %arg13: memref<1x4x8x128xf32, #tpu.memory_space<vmem>>) attributes {dimension_semantics = [#tpu.dimension_semantics<parallel>, #tpu.dimension_semantics<parallel>], iteration_bounds = array<i64: 2, 2>, scalar_prefetch = 0 : i64, scratch_operands = 0 : i64, tpu.core_type = #tpu.core_type<tc>, window_params = [{transform_indices = @transform_0, window_bounds = array<i64: 1, 2, 2, 10, 16, 16>}, {pipeline_mode = #tpu.pipeline_mode<synchronous>, transform_indices = @transform_1, window_bounds = array<i64: 2, 2, 10, 16, 1>}, {pipeline_mode = #tpu.pipeline_mode<synchronous>, transform_indices = @transform_2, window_bounds = array<i64: 16, 128>}, {pipeline_mode = #tpu.pipeline_mode<synchronous>, transform_indices = @transform_3, window_bounds = array<i64: 1, 128>}, {pipeline_mode = #tpu.pipeline_mode<synchronous>, transform_indices = @transform_4, window_bounds = array<i64: 1, 128>}, {pipeline_mode = #tpu.pipeline_mode<synchronous>, transform_indices = @transform_5, window_bounds = array<i64: 5, 5, 128>}, {pipeline_mode = #tpu.pipeline_mode<synchronous>, transform_indices = @transform_6, window_bounds = array<i64: 1, 128>}, {pipeline_mode = #tpu.pipeline_mode<synchronous>, transform_indices = @transform_7, window_bounds = array<i64: 1, 128>}, {pipeline_mode = #tpu.pipeline_mode<synchronous>, transform_indices = @transform_8, window_bounds = array<i64: 128, 128>}, {pipeline_mode = #tpu.pipeline_mode<synchronous>, transform_indices = @transform_9, window_bounds = array<i64: 1, 128>}, {pipeline_mode = #tpu.pipeline_mode<synchronous>, transform_indices = @transform_10, window_bounds = array<i64: 1, 128>}, {transform_indices = @transform_11, window_bounds = array<i64: 1, 4, 8, 128>}]} {
    %c4_i32 = arith.constant 4 : i32
    %0 = arith.muli %arg1, %c4_i32 : i32
    %c0 = arith.constant 0 : index
    %c0_0 = arith.constant 0 : index
    %1 = vector.load %arg4[%c0, %c0_0] : memref<16x128xf32, #tpu.memory_space<vmem>>, vector<16x128xf32>
    %c0_1 = arith.constant 0 : index
    %c0_2 = arith.constant 0 : index
    %2 = vector.load %arg5[%c0_1, %c0_2] : memref<1x128xf32, #tpu.memory_space<vmem>>, vector<1x128xf32>
    %c0_3 = arith.constant 0 : index
    %c0_4 = arith.constant 0 : index
    %3 = vector.load %arg6[%c0_3, %c0_4] : memref<1x128xf32, #tpu.memory_space<vmem>>, vector<1x128xf32>
    %c0_5 = arith.constant 0 : index
    %c0_6 = arith.constant 0 : index
    %c0_7 = arith.constant 0 : index
    %4 = vector.load %arg7[%c0_5, %c0_6, %c0_7] : memref<5x5x128xf32, #tpu.memory_space<vmem>>, vector<5x5x128xf32>
    %cst = arith.constant 0.000000e+00 : f32
    %5 = vector.broadcast %cst : f32 to vector<4x8x128xf32>
    %c0_8 = arith.constant 0 : index
    %c0_9 = arith.constant 0 : index
    %c0_10 = arith.constant 0 : index
    %6 = arith.index_cast %0 : i32 to index
    %c0_11 = arith.constant 0 : index
    %c0_12 = arith.constant 0 : index
    %7 = vector.load %arg2[%c0_8, %c0_9, %c0_10, %6, %c0_11, %c0_12] : memref<1x2x2x10x16x16xf32, #tpu.memory_space<vmem>>, vector<1x1x1x6x16x16xf32>
    %8 = vector.shape_cast %7 : vector<1x1x1x6x16x16xf32> to vector<6x16x16xf32>
    %c0_13 = arith.constant 0 : index
    %c0_14 = arith.constant 0 : index
    %9 = arith.index_cast %0 : i32 to index
    %c0_15 = arith.constant 0 : index
    %c0_16 = arith.constant 0 : index
    %10 = vector.load %arg3[%c0_13, %c0_14, %9, %c0_15, %c0_16] : memref<2x2x10x16x1xf32, #tpu.memory_space<vmem>>, vector<1x1x6x16x1xf32>
    %11 = vector.shape_cast %10 : vector<1x1x6x16x1xf32> to vector<6x16x1xf32>
    %12 = vector.shape_cast %8 : vector<6x16x16xf32> to vector<96x16xf32>
    %cst_17 = arith.constant dense<0.000000e+00> : vector<96x128xf32>
    %13 = tpu.matmul %12, %1, %cst_17 {dimension_numbers = #tpu.dot_dimension_numbers<[1], [0], [0], [1], [0, 0, 1, 1], [], []>} : vector<96x16xf32>, vector<16x128xf32>, vector<96x128xf32> -> vector<96x128xf32>
    %14 = vector.broadcast %2 : vector<1x128xf32> to vector<96x128xf32>
    %15 = arith.mulf %13, %14 : vector<96x128xf32>
    %16 = vector.broadcast %3 : vector<1x128xf32> to vector<96x128xf32>
    %17 = arith.addf %15, %16 : vector<96x128xf32>
    %cst_18 = arith.constant 0.000000e+00 : f32
    %cst_19 = arith.constant 6.000000e+00 : f32
    %18 = vector.broadcast %cst_18 : f32 to vector<96x128xf32>
    %19 = arith.maximumf %18, %17 : vector<96x128xf32>
    %20 = vector.broadcast %cst_19 : f32 to vector<96x128xf32>
    %21 = arith.minimumf %20, %19 : vector<96x128xf32>
    %22 = vector.shape_cast %21 : vector<96x128xf32> to vector<6x16x128xf32>
    %23 = vector.broadcast %11 : vector<6x16x1xf32> to vector<6x16x128xf32>
    %24 = arith.mulf %22, %23 : vector<6x16x128xf32>
    %25 = vector.extract_strided_slice %24 {offsets = [0, 0, 0], sizes = [6, 8, 128], strides = [1, 1, 1]} : vector<6x16x128xf32> to vector<6x8x128xf32>
    %26 = vector.extract_strided_slice %25 {offsets = [0, 0, 0], sizes = [4, 8, 128], strides = [1, 1, 1]} : vector<6x8x128xf32> to vector<4x8x128xf32>
    %27 = vector.extract_strided_slice %4 {offsets = [0, 0, 0], sizes = [1, 1, 128], strides = [1, 1, 1]} : vector<5x5x128xf32> to vector<1x1x128xf32>
    %28 = vector.shape_cast %27 : vector<1x1x128xf32> to vector<128xf32>
    %29 = vector.shape_cast %28 : vector<128xf32> to vector<1x1x128xf32>
    %30 = vector.broadcast %29 : vector<1x1x128xf32> to vector<4x8x128xf32>
    %31 = arith.mulf %26, %30 : vector<4x8x128xf32>
    %32 = arith.addf %5, %31 : vector<4x8x128xf32>
    %33 = vector.extract_strided_slice %25 {offsets = [1, 0, 0], sizes = [4, 8, 128], strides = [1, 1, 1]} : vector<6x8x128xf32> to vector<4x8x128xf32>
    %34 = vector.extract_strided_slice %4 {offsets = [2, 0, 0], sizes = [1, 1, 128], strides = [1, 1, 1]} : vector<5x5x128xf32> to vector<1x1x128xf32>
    %35 = vector.shape_cast %34 : vector<1x1x128xf32> to vector<128xf32>
    %36 = vector.shape_cast %35 : vector<128xf32> to vector<1x1x128xf32>
    %37 = vector.broadcast %36 : vector<1x1x128xf32> to vector<4x8x128xf32>
    %38 = arith.mulf %33, %37 : vector<4x8x128xf32>
    %39 = arith.addf %32, %38 : vector<4x8x128xf32>
    %40 = vector.extract_strided_slice %25 {offsets = [2, 0, 0], sizes = [4, 8, 128], strides = [1, 1, 1]} : vector<6x8x128xf32> to vector<4x8x128xf32>
    %41 = vector.extract_strided_slice %4 {offsets = [4, 0, 0], sizes = [1, 1, 128], strides = [1, 1, 1]} : vector<5x5x128xf32> to vector<1x1x128xf32>
    %42 = vector.shape_cast %41 : vector<1x1x128xf32> to vector<128xf32>
    %43 = vector.shape_cast %42 : vector<128xf32> to vector<1x1x128xf32>
    %44 = vector.broadcast %43 : vector<1x1x128xf32> to vector<4x8x128xf32>
    %45 = arith.mulf %40, %44 : vector<4x8x128xf32>
    %46 = arith.addf %39, %45 : vector<4x8x128xf32>
    %47 = vector.extract_strided_slice %24 {offsets = [0, 1, 0], sizes = [6, 8, 128], strides = [1, 1, 1]} : vector<6x16x128xf32> to vector<6x8x128xf32>
    %48 = vector.extract_strided_slice %47 {offsets = [0, 0, 0], sizes = [4, 8, 128], strides = [1, 1, 1]} : vector<6x8x128xf32> to vector<4x8x128xf32>
    %49 = vector.extract_strided_slice %4 {offsets = [0, 2, 0], sizes = [1, 1, 128], strides = [1, 1, 1]} : vector<5x5x128xf32> to vector<1x1x128xf32>
    %50 = vector.shape_cast %49 : vector<1x1x128xf32> to vector<128xf32>
    %51 = vector.shape_cast %50 : vector<128xf32> to vector<1x1x128xf32>
    %52 = vector.broadcast %51 : vector<1x1x128xf32> to vector<4x8x128xf32>
    %53 = arith.mulf %48, %52 : vector<4x8x128xf32>
    %54 = arith.addf %46, %53 : vector<4x8x128xf32>
    %55 = vector.extract_strided_slice %47 {offsets = [1, 0, 0], sizes = [4, 8, 128], strides = [1, 1, 1]} : vector<6x8x128xf32> to vector<4x8x128xf32>
    %56 = vector.extract_strided_slice %4 {offsets = [2, 2, 0], sizes = [1, 1, 128], strides = [1, 1, 1]} : vector<5x5x128xf32> to vector<1x1x128xf32>
    %57 = vector.shape_cast %56 : vector<1x1x128xf32> to vector<128xf32>
    %58 = vector.shape_cast %57 : vector<128xf32> to vector<1x1x128xf32>
    %59 = vector.broadcast %58 : vector<1x1x128xf32> to vector<4x8x128xf32>
    %60 = arith.mulf %55, %59 : vector<4x8x128xf32>
    %61 = arith.addf %54, %60 : vector<4x8x128xf32>
    %62 = vector.extract_strided_slice %47 {offsets = [2, 0, 0], sizes = [4, 8, 128], strides = [1, 1, 1]} : vector<6x8x128xf32> to vector<4x8x128xf32>
    %63 = vector.extract_strided_slice %4 {offsets = [4, 2, 0], sizes = [1, 1, 128], strides = [1, 1, 1]} : vector<5x5x128xf32> to vector<1x1x128xf32>
    %64 = vector.shape_cast %63 : vector<1x1x128xf32> to vector<128xf32>
    %65 = vector.shape_cast %64 : vector<128xf32> to vector<1x1x128xf32>
    %66 = vector.broadcast %65 : vector<1x1x128xf32> to vector<4x8x128xf32>
    %67 = arith.mulf %62, %66 : vector<4x8x128xf32>
    %68 = arith.addf %61, %67 : vector<4x8x128xf32>
    %69 = vector.extract_strided_slice %24 {offsets = [0, 2, 0], sizes = [6, 8, 128], strides = [1, 1, 1]} : vector<6x16x128xf32> to vector<6x8x128xf32>
    %70 = vector.extract_strided_slice %69 {offsets = [0, 0, 0], sizes = [4, 8, 128], strides = [1, 1, 1]} : vector<6x8x128xf32> to vector<4x8x128xf32>
    %71 = vector.extract_strided_slice %4 {offsets = [0, 4, 0], sizes = [1, 1, 128], strides = [1, 1, 1]} : vector<5x5x128xf32> to vector<1x1x128xf32>
    %72 = vector.shape_cast %71 : vector<1x1x128xf32> to vector<128xf32>
    %73 = vector.shape_cast %72 : vector<128xf32> to vector<1x1x128xf32>
    %74 = vector.broadcast %73 : vector<1x1x128xf32> to vector<4x8x128xf32>
    %75 = arith.mulf %70, %74 : vector<4x8x128xf32>
    %76 = arith.addf %68, %75 : vector<4x8x128xf32>
    %77 = vector.extract_strided_slice %69 {offsets = [1, 0, 0], sizes = [4, 8, 128], strides = [1, 1, 1]} : vector<6x8x128xf32> to vector<4x8x128xf32>
    %78 = vector.extract_strided_slice %4 {offsets = [2, 4, 0], sizes = [1, 1, 128], strides = [1, 1, 1]} : vector<5x5x128xf32> to vector<1x1x128xf32>
    %79 = vector.shape_cast %78 : vector<1x1x128xf32> to vector<128xf32>
    %80 = vector.shape_cast %79 : vector<128xf32> to vector<1x1x128xf32>
    %81 = vector.broadcast %80 : vector<1x1x128xf32> to vector<4x8x128xf32>
    %82 = arith.mulf %77, %81 : vector<4x8x128xf32>
    %83 = arith.addf %76, %82 : vector<4x8x128xf32>
    %84 = vector.extract_strided_slice %69 {offsets = [2, 0, 0], sizes = [4, 8, 128], strides = [1, 1, 1]} : vector<6x8x128xf32> to vector<4x8x128xf32>
    %85 = vector.extract_strided_slice %4 {offsets = [4, 4, 0], sizes = [1, 1, 128], strides = [1, 1, 1]} : vector<5x5x128xf32> to vector<1x1x128xf32>
    %86 = vector.shape_cast %85 : vector<1x1x128xf32> to vector<128xf32>
    %87 = vector.shape_cast %86 : vector<128xf32> to vector<1x1x128xf32>
    %88 = vector.broadcast %87 : vector<1x1x128xf32> to vector<4x8x128xf32>
    %89 = arith.mulf %84, %88 : vector<4x8x128xf32>
    %90 = arith.addf %83, %89 : vector<4x8x128xf32>
    %c0_20 = arith.constant 0 : index
    %c0_21 = arith.constant 0 : index
    %c1 = arith.constant 1 : index
    %91 = arith.index_cast %0 : i32 to index
    %c0_22 = arith.constant 0 : index
    %c0_23 = arith.constant 0 : index
    %92 = vector.load %arg2[%c0_20, %c0_21, %c1, %91, %c0_22, %c0_23] : memref<1x2x2x10x16x16xf32, #tpu.memory_space<vmem>>, vector<1x1x1x6x16x16xf32>
    %93 = vector.shape_cast %92 : vector<1x1x1x6x16x16xf32> to vector<6x16x16xf32>
    %c0_24 = arith.constant 0 : index
    %c1_25 = arith.constant 1 : index
    %94 = arith.index_cast %0 : i32 to index
    %c0_26 = arith.constant 0 : index
    %c0_27 = arith.constant 0 : index
    %95 = vector.load %arg3[%c0_24, %c1_25, %94, %c0_26, %c0_27] : memref<2x2x10x16x1xf32, #tpu.memory_space<vmem>>, vector<1x1x6x16x1xf32>
    %96 = vector.shape_cast %95 : vector<1x1x6x16x1xf32> to vector<6x16x1xf32>
    %97 = vector.shape_cast %93 : vector<6x16x16xf32> to vector<96x16xf32>
    %cst_28 = arith.constant dense<0.000000e+00> : vector<96x128xf32>
    %98 = tpu.matmul %97, %1, %cst_28 {dimension_numbers = #tpu.dot_dimension_numbers<[1], [0], [0], [1], [0, 0, 1, 1], [], []>} : vector<96x16xf32>, vector<16x128xf32>, vector<96x128xf32> -> vector<96x128xf32>
    %99 = vector.broadcast %2 : vector<1x128xf32> to vector<96x128xf32>
    %100 = arith.mulf %98, %99 : vector<96x128xf32>
    %101 = vector.broadcast %3 : vector<1x128xf32> to vector<96x128xf32>
    %102 = arith.addf %100, %101 : vector<96x128xf32>
    %cst_29 = arith.constant 0.000000e+00 : f32
    %cst_30 = arith.constant 6.000000e+00 : f32
    %103 = vector.broadcast %cst_29 : f32 to vector<96x128xf32>
    %104 = arith.maximumf %103, %102 : vector<96x128xf32>
    %105 = vector.broadcast %cst_30 : f32 to vector<96x128xf32>
    %106 = arith.minimumf %105, %104 : vector<96x128xf32>
    %107 = vector.shape_cast %106 : vector<96x128xf32> to vector<6x16x128xf32>
    %108 = vector.broadcast %96 : vector<6x16x1xf32> to vector<6x16x128xf32>
    %109 = arith.mulf %107, %108 : vector<6x16x128xf32>
    %110 = vector.extract_strided_slice %109 {offsets = [0, 0, 0], sizes = [6, 8, 128], strides = [1, 1, 1]} : vector<6x16x128xf32> to vector<6x8x128xf32>
    %111 = vector.extract_strided_slice %110 {offsets = [0, 0, 0], sizes = [4, 8, 128], strides = [1, 1, 1]} : vector<6x8x128xf32> to vector<4x8x128xf32>
    %112 = vector.extract_strided_slice %4 {offsets = [0, 1, 0], sizes = [1, 1, 128], strides = [1, 1, 1]} : vector<5x5x128xf32> to vector<1x1x128xf32>
    %113 = vector.shape_cast %112 : vector<1x1x128xf32> to vector<128xf32>
    %114 = vector.shape_cast %113 : vector<128xf32> to vector<1x1x128xf32>
    %115 = vector.broadcast %114 : vector<1x1x128xf32> to vector<4x8x128xf32>
    %116 = arith.mulf %111, %115 : vector<4x8x128xf32>
    %117 = arith.addf %90, %116 : vector<4x8x128xf32>
    %118 = vector.extract_strided_slice %110 {offsets = [1, 0, 0], sizes = [4, 8, 128], strides = [1, 1, 1]} : vector<6x8x128xf32> to vector<4x8x128xf32>
    %119 = vector.extract_strided_slice %4 {offsets = [2, 1, 0], sizes = [1, 1, 128], strides = [1, 1, 1]} : vector<5x5x128xf32> to vector<1x1x128xf32>
    %120 = vector.shape_cast %119 : vector<1x1x128xf32> to vector<128xf32>
    %121 = vector.shape_cast %120 : vector<128xf32> to vector<1x1x128xf32>
    %122 = vector.broadcast %121 : vector<1x1x128xf32> to vector<4x8x128xf32>
    %123 = arith.mulf %118, %122 : vector<4x8x128xf32>
    %124 = arith.addf %117, %123 : vector<4x8x128xf32>
    %125 = vector.extract_strided_slice %110 {offsets = [2, 0, 0], sizes = [4, 8, 128], strides = [1, 1, 1]} : vector<6x8x128xf32> to vector<4x8x128xf32>
    %126 = vector.extract_strided_slice %4 {offsets = [4, 1, 0], sizes = [1, 1, 128], strides = [1, 1, 1]} : vector<5x5x128xf32> to vector<1x1x128xf32>
    %127 = vector.shape_cast %126 : vector<1x1x128xf32> to vector<128xf32>
    %128 = vector.shape_cast %127 : vector<128xf32> to vector<1x1x128xf32>
    %129 = vector.broadcast %128 : vector<1x1x128xf32> to vector<4x8x128xf32>
    %130 = arith.mulf %125, %129 : vector<4x8x128xf32>
    %131 = arith.addf %124, %130 : vector<4x8x128xf32>
    %132 = vector.extract_strided_slice %109 {offsets = [0, 1, 0], sizes = [6, 8, 128], strides = [1, 1, 1]} : vector<6x16x128xf32> to vector<6x8x128xf32>
    %133 = vector.extract_strided_slice %132 {offsets = [0, 0, 0], sizes = [4, 8, 128], strides = [1, 1, 1]} : vector<6x8x128xf32> to vector<4x8x128xf32>
    %134 = vector.extract_strided_slice %4 {offsets = [0, 3, 0], sizes = [1, 1, 128], strides = [1, 1, 1]} : vector<5x5x128xf32> to vector<1x1x128xf32>
    %135 = vector.shape_cast %134 : vector<1x1x128xf32> to vector<128xf32>
    %136 = vector.shape_cast %135 : vector<128xf32> to vector<1x1x128xf32>
    %137 = vector.broadcast %136 : vector<1x1x128xf32> to vector<4x8x128xf32>
    %138 = arith.mulf %133, %137 : vector<4x8x128xf32>
    %139 = arith.addf %131, %138 : vector<4x8x128xf32>
    %140 = vector.extract_strided_slice %132 {offsets = [1, 0, 0], sizes = [4, 8, 128], strides = [1, 1, 1]} : vector<6x8x128xf32> to vector<4x8x128xf32>
    %141 = vector.extract_strided_slice %4 {offsets = [2, 3, 0], sizes = [1, 1, 128], strides = [1, 1, 1]} : vector<5x5x128xf32> to vector<1x1x128xf32>
    %142 = vector.shape_cast %141 : vector<1x1x128xf32> to vector<128xf32>
    %143 = vector.shape_cast %142 : vector<128xf32> to vector<1x1x128xf32>
    %144 = vector.broadcast %143 : vector<1x1x128xf32> to vector<4x8x128xf32>
    %145 = arith.mulf %140, %144 : vector<4x8x128xf32>
    %146 = arith.addf %139, %145 : vector<4x8x128xf32>
    %147 = vector.extract_strided_slice %132 {offsets = [2, 0, 0], sizes = [4, 8, 128], strides = [1, 1, 1]} : vector<6x8x128xf32> to vector<4x8x128xf32>
    %148 = vector.extract_strided_slice %4 {offsets = [4, 3, 0], sizes = [1, 1, 128], strides = [1, 1, 1]} : vector<5x5x128xf32> to vector<1x1x128xf32>
    %149 = vector.shape_cast %148 : vector<1x1x128xf32> to vector<128xf32>
    %150 = vector.shape_cast %149 : vector<128xf32> to vector<1x1x128xf32>
    %151 = vector.broadcast %150 : vector<1x1x128xf32> to vector<4x8x128xf32>
    %152 = arith.mulf %147, %151 : vector<4x8x128xf32>
    %153 = arith.addf %146, %152 : vector<4x8x128xf32>
    %c0_31 = arith.constant 0 : index
    %c1_32 = arith.constant 1 : index
    %c0_33 = arith.constant 0 : index
    %154 = arith.index_cast %0 : i32 to index
    %c0_34 = arith.constant 0 : index
    %c0_35 = arith.constant 0 : index
    %155 = vector.load %arg2[%c0_31, %c1_32, %c0_33, %154, %c0_34, %c0_35] : memref<1x2x2x10x16x16xf32, #tpu.memory_space<vmem>>, vector<1x1x1x6x16x16xf32>
    %156 = vector.shape_cast %155 : vector<1x1x1x6x16x16xf32> to vector<6x16x16xf32>
    %c1_36 = arith.constant 1 : index
    %c0_37 = arith.constant 0 : index
    %157 = arith.index_cast %0 : i32 to index
    %c0_38 = arith.constant 0 : index
    %c0_39 = arith.constant 0 : index
    %158 = vector.load %arg3[%c1_36, %c0_37, %157, %c0_38, %c0_39] : memref<2x2x10x16x1xf32, #tpu.memory_space<vmem>>, vector<1x1x6x16x1xf32>
    %159 = vector.shape_cast %158 : vector<1x1x6x16x1xf32> to vector<6x16x1xf32>
    %160 = vector.shape_cast %156 : vector<6x16x16xf32> to vector<96x16xf32>
    %cst_40 = arith.constant dense<0.000000e+00> : vector<96x128xf32>
    %161 = tpu.matmul %160, %1, %cst_40 {dimension_numbers = #tpu.dot_dimension_numbers<[1], [0], [0], [1], [0, 0, 1, 1], [], []>} : vector<96x16xf32>, vector<16x128xf32>, vector<96x128xf32> -> vector<96x128xf32>
    %162 = vector.broadcast %2 : vector<1x128xf32> to vector<96x128xf32>
    %163 = arith.mulf %161, %162 : vector<96x128xf32>
    %164 = vector.broadcast %3 : vector<1x128xf32> to vector<96x128xf32>
    %165 = arith.addf %163, %164 : vector<96x128xf32>
    %cst_41 = arith.constant 0.000000e+00 : f32
    %cst_42 = arith.constant 6.000000e+00 : f32
    %166 = vector.broadcast %cst_41 : f32 to vector<96x128xf32>
    %167 = arith.maximumf %166, %165 : vector<96x128xf32>
    %168 = vector.broadcast %cst_42 : f32 to vector<96x128xf32>
    %169 = arith.minimumf %168, %167 : vector<96x128xf32>
    %170 = vector.shape_cast %169 : vector<96x128xf32> to vector<6x16x128xf32>
    %171 = vector.broadcast %159 : vector<6x16x1xf32> to vector<6x16x128xf32>
    %172 = arith.mulf %170, %171 : vector<6x16x128xf32>
    %173 = vector.extract_strided_slice %172 {offsets = [0, 0, 0], sizes = [6, 8, 128], strides = [1, 1, 1]} : vector<6x16x128xf32> to vector<6x8x128xf32>
    %174 = vector.extract_strided_slice %173 {offsets = [0, 0, 0], sizes = [4, 8, 128], strides = [1, 1, 1]} : vector<6x8x128xf32> to vector<4x8x128xf32>
    %175 = vector.extract_strided_slice %4 {offsets = [1, 0, 0], sizes = [1, 1, 128], strides = [1, 1, 1]} : vector<5x5x128xf32> to vector<1x1x128xf32>
    %176 = vector.shape_cast %175 : vector<1x1x128xf32> to vector<128xf32>
    %177 = vector.shape_cast %176 : vector<128xf32> to vector<1x1x128xf32>
    %178 = vector.broadcast %177 : vector<1x1x128xf32> to vector<4x8x128xf32>
    %179 = arith.mulf %174, %178 : vector<4x8x128xf32>
    %180 = arith.addf %153, %179 : vector<4x8x128xf32>
    %181 = vector.extract_strided_slice %173 {offsets = [1, 0, 0], sizes = [4, 8, 128], strides = [1, 1, 1]} : vector<6x8x128xf32> to vector<4x8x128xf32>
    %182 = vector.extract_strided_slice %4 {offsets = [3, 0, 0], sizes = [1, 1, 128], strides = [1, 1, 1]} : vector<5x5x128xf32> to vector<1x1x128xf32>
    %183 = vector.shape_cast %182 : vector<1x1x128xf32> to vector<128xf32>
    %184 = vector.shape_cast %183 : vector<128xf32> to vector<1x1x128xf32>
    %185 = vector.broadcast %184 : vector<1x1x128xf32> to vector<4x8x128xf32>
    %186 = arith.mulf %181, %185 : vector<4x8x128xf32>
    %187 = arith.addf %180, %186 : vector<4x8x128xf32>
    %188 = vector.extract_strided_slice %172 {offsets = [0, 1, 0], sizes = [6, 8, 128], strides = [1, 1, 1]} : vector<6x16x128xf32> to vector<6x8x128xf32>
    %189 = vector.extract_strided_slice %188 {offsets = [0, 0, 0], sizes = [4, 8, 128], strides = [1, 1, 1]} : vector<6x8x128xf32> to vector<4x8x128xf32>
    %190 = vector.extract_strided_slice %4 {offsets = [1, 2, 0], sizes = [1, 1, 128], strides = [1, 1, 1]} : vector<5x5x128xf32> to vector<1x1x128xf32>
    %191 = vector.shape_cast %190 : vector<1x1x128xf32> to vector<128xf32>
    %192 = vector.shape_cast %191 : vector<128xf32> to vector<1x1x128xf32>
    %193 = vector.broadcast %192 : vector<1x1x128xf32> to vector<4x8x128xf32>
    %194 = arith.mulf %189, %193 : vector<4x8x128xf32>
    %195 = arith.addf %187, %194 : vector<4x8x128xf32>
    %196 = vector.extract_strided_slice %188 {offsets = [1, 0, 0], sizes = [4, 8, 128], strides = [1, 1, 1]} : vector<6x8x128xf32> to vector<4x8x128xf32>
    %197 = vector.extract_strided_slice %4 {offsets = [3, 2, 0], sizes = [1, 1, 128], strides = [1, 1, 1]} : vector<5x5x128xf32> to vector<1x1x128xf32>
    %198 = vector.shape_cast %197 : vector<1x1x128xf32> to vector<128xf32>
    %199 = vector.shape_cast %198 : vector<128xf32> to vector<1x1x128xf32>
    %200 = vector.broadcast %199 : vector<1x1x128xf32> to vector<4x8x128xf32>
    %201 = arith.mulf %196, %200 : vector<4x8x128xf32>
    %202 = arith.addf %195, %201 : vector<4x8x128xf32>
    %203 = vector.extract_strided_slice %172 {offsets = [0, 2, 0], sizes = [6, 8, 128], strides = [1, 1, 1]} : vector<6x16x128xf32> to vector<6x8x128xf32>
    %204 = vector.extract_strided_slice %203 {offsets = [0, 0, 0], sizes = [4, 8, 128], strides = [1, 1, 1]} : vector<6x8x128xf32> to vector<4x8x128xf32>
    %205 = vector.extract_strided_slice %4 {offsets = [1, 4, 0], sizes = [1, 1, 128], strides = [1, 1, 1]} : vector<5x5x128xf32> to vector<1x1x128xf32>
    %206 = vector.shape_cast %205 : vector<1x1x128xf32> to vector<128xf32>
    %207 = vector.shape_cast %206 : vector<128xf32> to vector<1x1x128xf32>
    %208 = vector.broadcast %207 : vector<1x1x128xf32> to vector<4x8x128xf32>
    %209 = arith.mulf %204, %208 : vector<4x8x128xf32>
    %210 = arith.addf %202, %209 : vector<4x8x128xf32>
    %211 = vector.extract_strided_slice %203 {offsets = [1, 0, 0], sizes = [4, 8, 128], strides = [1, 1, 1]} : vector<6x8x128xf32> to vector<4x8x128xf32>
    %212 = vector.extract_strided_slice %4 {offsets = [3, 4, 0], sizes = [1, 1, 128], strides = [1, 1, 1]} : vector<5x5x128xf32> to vector<1x1x128xf32>
    %213 = vector.shape_cast %212 : vector<1x1x128xf32> to vector<128xf32>
    %214 = vector.shape_cast %213 : vector<128xf32> to vector<1x1x128xf32>
    %215 = vector.broadcast %214 : vector<1x1x128xf32> to vector<4x8x128xf32>
    %216 = arith.mulf %211, %215 : vector<4x8x128xf32>
    %217 = arith.addf %210, %216 : vector<4x8x128xf32>
    %c0_43 = arith.constant 0 : index
    %c1_44 = arith.constant 1 : index
    %c1_45 = arith.constant 1 : index
    %218 = arith.index_cast %0 : i32 to index
    %c0_46 = arith.constant 0 : index
    %c0_47 = arith.constant 0 : index
    %219 = vector.load %arg2[%c0_43, %c1_44, %c1_45, %218, %c0_46, %c0_47] : memref<1x2x2x10x16x16xf32, #tpu.memory_space<vmem>>, vector<1x1x1x6x16x16xf32>
    %220 = vector.shape_cast %219 : vector<1x1x1x6x16x16xf32> to vector<6x16x16xf32>
    %c1_48 = arith.constant 1 : index
    %c1_49 = arith.constant 1 : index
    %221 = arith.index_cast %0 : i32 to index
    %c0_50 = arith.constant 0 : index
    %c0_51 = arith.constant 0 : index
    %222 = vector.load %arg3[%c1_48, %c1_49, %221, %c0_50, %c0_51] : memref<2x2x10x16x1xf32, #tpu.memory_space<vmem>>, vector<1x1x6x16x1xf32>
    %223 = vector.shape_cast %222 : vector<1x1x6x16x1xf32> to vector<6x16x1xf32>
    %224 = vector.shape_cast %220 : vector<6x16x16xf32> to vector<96x16xf32>
    %cst_52 = arith.constant dense<0.000000e+00> : vector<96x128xf32>
    %225 = tpu.matmul %224, %1, %cst_52 {dimension_numbers = #tpu.dot_dimension_numbers<[1], [0], [0], [1], [0, 0, 1, 1], [], []>} : vector<96x16xf32>, vector<16x128xf32>, vector<96x128xf32> -> vector<96x128xf32>
    %226 = vector.broadcast %2 : vector<1x128xf32> to vector<96x128xf32>
    %227 = arith.mulf %225, %226 : vector<96x128xf32>
    %228 = vector.broadcast %3 : vector<1x128xf32> to vector<96x128xf32>
    %229 = arith.addf %227, %228 : vector<96x128xf32>
    %cst_53 = arith.constant 0.000000e+00 : f32
    %cst_54 = arith.constant 6.000000e+00 : f32
    %230 = vector.broadcast %cst_53 : f32 to vector<96x128xf32>
    %231 = arith.maximumf %230, %229 : vector<96x128xf32>
    %232 = vector.broadcast %cst_54 : f32 to vector<96x128xf32>
    %233 = arith.minimumf %232, %231 : vector<96x128xf32>
    %234 = vector.shape_cast %233 : vector<96x128xf32> to vector<6x16x128xf32>
    %235 = vector.broadcast %223 : vector<6x16x1xf32> to vector<6x16x128xf32>
    %236 = arith.mulf %234, %235 : vector<6x16x128xf32>
    %237 = vector.extract_strided_slice %236 {offsets = [0, 0, 0], sizes = [6, 8, 128], strides = [1, 1, 1]} : vector<6x16x128xf32> to vector<6x8x128xf32>
    %238 = vector.extract_strided_slice %237 {offsets = [0, 0, 0], sizes = [4, 8, 128], strides = [1, 1, 1]} : vector<6x8x128xf32> to vector<4x8x128xf32>
    %239 = vector.extract_strided_slice %4 {offsets = [1, 1, 0], sizes = [1, 1, 128], strides = [1, 1, 1]} : vector<5x5x128xf32> to vector<1x1x128xf32>
    %240 = vector.shape_cast %239 : vector<1x1x128xf32> to vector<128xf32>
    %241 = vector.shape_cast %240 : vector<128xf32> to vector<1x1x128xf32>
    %242 = vector.broadcast %241 : vector<1x1x128xf32> to vector<4x8x128xf32>
    %243 = arith.mulf %238, %242 : vector<4x8x128xf32>
    %244 = arith.addf %217, %243 : vector<4x8x128xf32>
    %245 = vector.extract_strided_slice %237 {offsets = [1, 0, 0], sizes = [4, 8, 128], strides = [1, 1, 1]} : vector<6x8x128xf32> to vector<4x8x128xf32>
    %246 = vector.extract_strided_slice %4 {offsets = [3, 1, 0], sizes = [1, 1, 128], strides = [1, 1, 1]} : vector<5x5x128xf32> to vector<1x1x128xf32>
    %247 = vector.shape_cast %246 : vector<1x1x128xf32> to vector<128xf32>
    %248 = vector.shape_cast %247 : vector<128xf32> to vector<1x1x128xf32>
    %249 = vector.broadcast %248 : vector<1x1x128xf32> to vector<4x8x128xf32>
    %250 = arith.mulf %245, %249 : vector<4x8x128xf32>
    %251 = arith.addf %244, %250 : vector<4x8x128xf32>
    %252 = vector.extract_strided_slice %236 {offsets = [0, 1, 0], sizes = [6, 8, 128], strides = [1, 1, 1]} : vector<6x16x128xf32> to vector<6x8x128xf32>
    %253 = vector.extract_strided_slice %252 {offsets = [0, 0, 0], sizes = [4, 8, 128], strides = [1, 1, 1]} : vector<6x8x128xf32> to vector<4x8x128xf32>
    %254 = vector.extract_strided_slice %4 {offsets = [1, 3, 0], sizes = [1, 1, 128], strides = [1, 1, 1]} : vector<5x5x128xf32> to vector<1x1x128xf32>
    %255 = vector.shape_cast %254 : vector<1x1x128xf32> to vector<128xf32>
    %256 = vector.shape_cast %255 : vector<128xf32> to vector<1x1x128xf32>
    %257 = vector.broadcast %256 : vector<1x1x128xf32> to vector<4x8x128xf32>
    %258 = arith.mulf %253, %257 : vector<4x8x128xf32>
    %259 = arith.addf %251, %258 : vector<4x8x128xf32>
    %260 = vector.extract_strided_slice %252 {offsets = [1, 0, 0], sizes = [4, 8, 128], strides = [1, 1, 1]} : vector<6x8x128xf32> to vector<4x8x128xf32>
    %261 = vector.extract_strided_slice %4 {offsets = [3, 3, 0], sizes = [1, 1, 128], strides = [1, 1, 1]} : vector<5x5x128xf32> to vector<1x1x128xf32>
    %262 = vector.shape_cast %261 : vector<1x1x128xf32> to vector<128xf32>
    %263 = vector.shape_cast %262 : vector<128xf32> to vector<1x1x128xf32>
    %264 = vector.broadcast %263 : vector<1x1x128xf32> to vector<4x8x128xf32>
    %265 = arith.mulf %260, %264 : vector<4x8x128xf32>
    %266 = arith.addf %259, %265 : vector<4x8x128xf32>
    %c0_55 = arith.constant 0 : index
    %c0_56 = arith.constant 0 : index
    %267 = vector.load %arg8[%c0_55, %c0_56] : memref<1x128xf32, #tpu.memory_space<vmem>>, vector<1x128xf32>
    %268 = vector.shape_cast %267 : vector<1x128xf32> to vector<1x1x128xf32>
    %269 = vector.broadcast %268 : vector<1x1x128xf32> to vector<4x8x128xf32>
    %270 = arith.mulf %266, %269 : vector<4x8x128xf32>
    %c0_57 = arith.constant 0 : index
    %c0_58 = arith.constant 0 : index
    %271 = vector.load %arg9[%c0_57, %c0_58] : memref<1x128xf32, #tpu.memory_space<vmem>>, vector<1x128xf32>
    %272 = vector.shape_cast %271 : vector<1x128xf32> to vector<1x1x128xf32>
    %273 = vector.broadcast %272 : vector<1x1x128xf32> to vector<4x8x128xf32>
    %274 = arith.addf %270, %273 : vector<4x8x128xf32>
    %cst_59 = arith.constant 0.000000e+00 : f32
    %cst_60 = arith.constant 6.000000e+00 : f32
    %275 = vector.broadcast %cst_59 : f32 to vector<4x8x128xf32>
    %276 = arith.maximumf %275, %274 : vector<4x8x128xf32>
    %277 = vector.broadcast %cst_60 : f32 to vector<4x8x128xf32>
    %278 = arith.minimumf %277, %276 : vector<4x8x128xf32>
    %279 = vector.shape_cast %278 : vector<4x8x128xf32> to vector<32x128xf32>
    %c0_61 = arith.constant 0 : index
    %c0_62 = arith.constant 0 : index
    %280 = vector.load %arg10[%c0_61, %c0_62] : memref<128x128xf32, #tpu.memory_space<vmem>>, vector<128x128xf32>
    %cst_63 = arith.constant dense<0.000000e+00> : vector<32x128xf32>
    %281 = tpu.matmul %279, %280, %cst_63 {dimension_numbers = #tpu.dot_dimension_numbers<[1], [0], [0], [1], [0, 0, 1, 1], [], []>} : vector<32x128xf32>, vector<128x128xf32>, vector<32x128xf32> -> vector<32x128xf32>
    %c0_64 = arith.constant 0 : index
    %c0_65 = arith.constant 0 : index
    %282 = vector.load %arg11[%c0_64, %c0_65] : memref<1x128xf32, #tpu.memory_space<vmem>>, vector<1x128xf32>
    %283 = vector.broadcast %282 : vector<1x128xf32> to vector<32x128xf32>
    %284 = arith.mulf %281, %283 : vector<32x128xf32>
    %c0_66 = arith.constant 0 : index
    %c0_67 = arith.constant 0 : index
    %285 = vector.load %arg12[%c0_66, %c0_67] : memref<1x128xf32, #tpu.memory_space<vmem>>, vector<1x128xf32>
    %286 = vector.broadcast %285 : vector<1x128xf32> to vector<32x128xf32>
    %287 = arith.addf %284, %286 : vector<32x128xf32>
    %288 = vector.shape_cast %287 : vector<32x128xf32> to vector<4x8x128xf32>
    %c0_68 = arith.constant 0 : index
    %c0_69 = arith.constant 0 : index
    %c0_70 = arith.constant 0 : index
    %c0_71 = arith.constant 0 : index
    %289 = vector.load %arg13[%c0_68, %c0_69, %c0_70, %c0_71] : memref<1x4x8x128xf32, #tpu.memory_space<vmem>>, vector<1x4x8x128xf32>
    %290 = vector.shape_cast %289 : vector<1x4x8x128xf32> to vector<4x8x128xf32>
    %291 = vector.shape_cast %288 : vector<4x8x128xf32> to vector<1x4x8x128xf32>
    tpu.vector_store %arg13[%c0_68, %c0_69, %c0_70, %c0_71], %291 {strides = array<i32>} : memref<1x4x8x128xf32, #tpu.memory_space<vmem>>, vector<1x4x8x128xf32>,
    return
  }
  func.func @transform_0(%arg0: i32, %arg1: i32) -> (i32, i32, i32, i32, i32, i32) {
    %c0_i32 = arith.constant 0 : i32
    %c0_i32_0 = arith.constant 0 : i32
    %c0_i32_1 = arith.constant 0 : i32
    %c0_i32_2 = arith.constant 0 : i32
    %c0_i32_3 = arith.constant 0 : i32
    %c0_i32_4 = arith.constant 0 : i32
    return %arg0, %c0_i32, %c0_i32_0, %c0_i32_1, %c0_i32_2, %c0_i32_3 : i32, i32, i32, i32, i32, i32
  }
  func.func @transform_1(%arg0: i32, %arg1: i32) -> (i32, i32, i32, i32, i32) {
    %c0_i32 = arith.constant 0 : i32
    %c0_i32_0 = arith.constant 0 : i32
    %c0_i32_1 = arith.constant 0 : i32
    %c0_i32_2 = arith.constant 0 : i32
    %c0_i32_3 = arith.constant 0 : i32
    %c0_i32_4 = arith.constant 0 : i32
    return %c0_i32, %c0_i32_0, %c0_i32_1, %c0_i32_2, %c0_i32_3 : i32, i32, i32, i32, i32
  }
  func.func @transform_2(%arg0: i32, %arg1: i32) -> (i32, i32) {
    %c0_i32 = arith.constant 0 : i32
    %c0_i32_0 = arith.constant 0 : i32
    %c0_i32_1 = arith.constant 0 : i32
    return %c0_i32, %c0_i32_0 : i32, i32
  }
  func.func @transform_3(%arg0: i32, %arg1: i32) -> (i32, i32) {
    %c0_i32 = arith.constant 0 : i32
    %c0_i32_0 = arith.constant 0 : i32
    %c0_i32_1 = arith.constant 0 : i32
    return %c0_i32, %c0_i32_0 : i32, i32
  }
  func.func @transform_4(%arg0: i32, %arg1: i32) -> (i32, i32) {
    %c0_i32 = arith.constant 0 : i32
    %c0_i32_0 = arith.constant 0 : i32
    %c0_i32_1 = arith.constant 0 : i32
    return %c0_i32, %c0_i32_0 : i32, i32
  }
  func.func @transform_5(%arg0: i32, %arg1: i32) -> (i32, i32, i32) {
    %c0_i32 = arith.constant 0 : i32
    %c0_i32_0 = arith.constant 0 : i32
    %c0_i32_1 = arith.constant 0 : i32
    %c0_i32_2 = arith.constant 0 : i32
    return %c0_i32, %c0_i32_0, %c0_i32_1 : i32, i32, i32
  }
  func.func @transform_6(%arg0: i32, %arg1: i32) -> (i32, i32) {
    %c0_i32 = arith.constant 0 : i32
    %c0_i32_0 = arith.constant 0 : i32
    %c0_i32_1 = arith.constant 0 : i32
    return %c0_i32, %c0_i32_0 : i32, i32
  }
  func.func @transform_7(%arg0: i32, %arg1: i32) -> (i32, i32) {
    %c0_i32 = arith.constant 0 : i32
    %c0_i32_0 = arith.constant 0 : i32
    %c0_i32_1 = arith.constant 0 : i32
    return %c0_i32, %c0_i32_0 : i32, i32
  }
  func.func @transform_8(%arg0: i32, %arg1: i32) -> (i32, i32) {
    %c0_i32 = arith.constant 0 : i32
    %c0_i32_0 = arith.constant 0 : i32
    %c0_i32_1 = arith.constant 0 : i32
    return %c0_i32, %c0_i32_0 : i32, i32
  }
  func.func @transform_9(%arg0: i32, %arg1: i32) -> (i32, i32) {
    %c0_i32 = arith.constant 0 : i32
    %c0_i32_0 = arith.constant 0 : i32
    %c0_i32_1 = arith.constant 0 : i32
    return %c0_i32, %c0_i32_0 : i32, i32
  }
  func.func @transform_10(%arg0: i32, %arg1: i32) -> (i32, i32) {
    %c0_i32 = arith.constant 0 : i32
    %c0_i32_0 = arith.constant 0 : i32
    %c0_i32_1 = arith.constant 0 : i32
    return %c0_i32, %c0_i32_0 : i32, i32
  }
  func.func @transform_11(%arg0: i32, %arg1: i32) -> (i32, i32, i32, i32) {
    %c0_i32 = arith.constant 0 : i32
    %c0_i32_0 = arith.constant 0 : i32
    %c0_i32_1 = arith.constant 0 : i32
    return %arg0, %arg1, %c0_i32, %c0_i32_0 : i32, i32, i32, i32
  }
}

</mosaic_0001>

<bundles_post_ra>
// kernel: mbconv_forward.1
= control target key start
LH: loop header
LB: loop body
LE: loop exit
PB: predicated region body
PF: predicated region fallthrough
CT: control target
= control target key end

     0   :  { %s2461_s17 = smov 0   ;;  %s2463_s18 = smov 0   ;;  %s3714_s0 = inlined_call_operand.vmem [shape: f32[2,2,2,10,16,16], index: 0, kind: input, shape index: {}]   ;;  %s3715_s1 = inlined_call_operand.vmem [shape: f32[2,2,10,16,1], index: 1, kind: input, shape index: {}]   ;;  %s3716_s2 = inlined_call_operand.vmem [shape: f32[16,128], index: 2, kind: input, shape index: {}]   ;;  %s3717_s3 = inlined_call_operand.vmem [shape: f32[1,128], index: 3, kind: input, shape index: {}]   ;;  %s3718_s4 = inlined_call_operand.vmem [shape: f32[1,128], index: 4, kind: input, shape index: {}]   ;;  %s3719_s5 = inlined_call_operand.vmem [shape: f32[5,5,128], index: 5, kind: input, shape index: {}]   ;;  %s3720_s6 = inlined_call_operand.vmem [shape: f32[1,128], index: 6, kind: input, shape index: {}]   ;;  %s3721_s7 = inlined_call_operand.vmem [shape: f32[1,128], index: 7, kind: input, shape index: {}]   ;;  %s3722_s8 = inlined_call_operand.vmem [shape: f32[128,128], index: 8, kind: input, shape index: {}]   ;;  %s3723_s9 = inlined_call_operand.vmem [shape: f32[1,128], index: 9, kind: input, shape index: {}]   ;;  %s3724_s10 = inlined_call_operand.vmem [shape: f32[1,128], index: 10, kind: input, shape index: {}]   ;;  %s3725_s11 = inlined_call_operand.vmem [shape: f32[2,8,8,128], index: 11, kind: output, shape index: {}]  }
   0x1   :  { %s2465_s19 = smov 0   ;;  %s2467_s20 = smov 0  }
   0x2   :  { %s2469_s21 = smov 0  }
   0x3 LB: > { %s30_s22 = sadd.s32 1, %s2390_s19  ;;  %s33_s23 = sadd.s32 1, %s2394_s20  ;;  %s2398_s21 = sphi %s2469_s21, %s21_s21   ;;  %s2394_s20 = sphi %s2467_s20, %s3936_s20   ;;  %s2390_s19 = sphi %s2465_s19, %s3935_s19   ;;  %s2386_s18 = sphi %s2463_s18, %s3934_s18   ;;  %s2382_s17 = sphi %s2461_s17, %s3933_s17  }
   0x4   : > { %p31_p0 = scmp.ge.s32.totalorder %s30_s22, 2  ;;  %p2169_p1 = scmp.ge.s32.totalorder %s2398_s21, 1 }
   0x5   : > { %p351_p2 = scmp.lt.s32.totalorder %s2398_s21, 5 }
   0x6   : > { %s3938_s22 = smov (%p31_p0, %s30_s22), 0  ;;  %s3940_s23 = smov (!%p31_p0, %s33_s23), %s2394_s20 }
   0x7   : > { %p352_p3 = pnand %p2169_p1, %p351_p2  ;;  %p35_p4 = scmp.ge.s32.totalorder %s3940_s23, 2 }
   0x9   : > { %s3942_s23 = smov (%p35_p4, %s3940_s23), 0  ;;  %355 = sbr.rel (%p352_p3) target bundleno = 477 (0x1dd), region = 64 }
   0xe   : > { %s2300_s24 = sshll.u32 %s2382_s17, 6  ;;  %p395_p5 = scmp.lt.s32.totalorder %s2386_s18, 1  ;;  %v412_v0 = vld [vmem:[%s3716_s2 + $0x8] sm:$0xff]  ;;  %v2400_v1 = vmov 0   ;;  %v411_v5 = vld [vmem:[%s3716_s2] sm:$0xff]  ;;  %vm447_vm0 = vcmask 130048  }
   0xf   : > { %2351 = vset.pattern.permute.xlu2 %v2400_v1  ;;  %2350 = vset.pattern.permute.xlu1 %v2400_v1  ;;  %s2500_s29 = scalar_lea.vmem %s3715_s1, %s2300_s24  ;;  %vm707_vm1 = vcmask 1046528   ;;  %vm819_vm2 = vcmask 1045504  }
  0x10   : > { %2349 = vset.pattern.permute.xlu0 %v2400_v1  ;;  %v438_v2 = vld [vmem:[%s2500_s29 + $0x18] sm:$0xff]  ;;  %s3944_s18 = smov (!%p395_p5, %s2386_s18), 1  ;;  %v437_v3 = vld [vmem:[%s2500_s29 + $0x10] sm:$0xff]  ;;  %v435_v4 = vld [vmem:[%s2500_s29] sm:$0xff]  ;;  %498 = vmatpush.msra.mxu0 %v412_v0 }
  0x11   : > { %608 = vperm.xlu2 %2351, %v438_v2   ;;  %603 = vperm.xlu1 %2350, %v437_v3   ;;  %s2307_s13 = smul.u32 640, %s3944_s18  ;;  %v440_v6 = vld [vmem:[%s2500_s29 + $0x28] sm:$0xff]  ;;  %v439_v7 = vld [vmem:[%s2500_s29 + $0x20] sm:$0xff]  ;;  %v442_v18 = vld [vmem:[%s2500_s29 + $0x38] sm:$0xff] }
  0x12   : > { %593 = vperm.xlu0 %2349, %v435_v4   ;;  %2301 = vmatpush.msra.mxu1 %v412_v0  ;;  %v436_v12 = vld [vmem:[%s2500_s29 + $0x8] sm:$0xff]  ;;  %v2202_v17 = vld [vmem:[%s2500_s29 + $0xa0] sm:$0xff]  ;;  %v441_v19 = vld [vmem:[%s2500_s29 + $0x30] sm:$0xff] }
  0x13   : > { %2302 = vmatpush.msra.mxu2 %v412_v0  ;;  %2303 = vmatpush.msra.mxu3 %v412_v0  ;;  %s399_s16 = scalar_lea.vmem %s3714_s0, %s2307_s13  ;;  %v2203_v24 = vld [vmem:[%s2500_s29 + $0xa8] sm:$0xff]  ;;  %v2204_v25 = vld [vmem:[%s2500_s29 + $0xb0] sm:$0xff]  ;;  %v443_v26 = vld [vmem:[%s2500_s29 + $0x40] sm:$0xff] }
  0x14   : > { %499 = vmatpush.msra.mxu0 %v411_v5  ;;  %2304 = vmatpush.msra.mxu1 %v411_v5  ;;  %s2516_s25 = scalar_lea.vmem %s399_s16, %s2300_s24  ;;  %v2205_v31 = vld [vmem:[%s2500_s29 + $0xb8] sm:$0xff]  ;;  %v444_v32 = vld [vmem:[%s2500_s29 + $0x48] sm:$0xff]  ;;  %v2206_v33 = vld [vmem:[%s2500_s29 + $0xc0] sm:$0xff]  ;;  %s2172_s16 = sshll.u32 %s3944_s18, 3 }
  0x15   : > { %2305 = vmatpush.msra.mxu2 %v411_v5  ;;  %2306 = vmatpush.msra.mxu3 %v411_v5  ;;  %v422_v8 = vld [vmem:[%s2516_s25] sm:$0xff]  ;;  %v431_v9 = vld [vmem:[%s2516_s25 + $0x48] sm:$0xff]  ;;  %v432_v10 = vld [vmem:[%s2516_s25 + $0x50] sm:$0xff] }
  0x16   : > { %991 = vmatpush.msrb.mxu1 %v412_v0  ;;  %2176 = vmatmul.msk.f32.vlgmr.msra.gmra.mxu0 %vm447_vm0, %v422_v8  ;;  %v433_v11 = vld [vmem:[%s2516_s25 + $0x58] sm:$0xff]  ;;  %v423_v13 = vld [vmem:[%s2516_s25 + $0x8] sm:$0xff]  ;;  %v2189_v14 = vld [vmem:[%s2516_s25 + $0xa0] sm:$0xff] }
  0x17   : > { %1363 = vmatpush.msrb.mxu2 %v412_v0  ;;  %2185 = vmatmul.msk.f32.vlgmr.msra.gmra.mxu1 %vm447_vm0, %v431_v9  ;;  %v2227_v15 = vld [vmem:[%s2516_s25 + $0x140] sm:$0xff]  ;;  %v424_v20 = vld [vmem:[%s2516_s25 + $0x10] sm:$0xff]  ;;  %v2190_v21 = vld [vmem:[%s2516_s25 + $0xa8] sm:$0xff] }
  0x18   : > { %2186 = vmatmul.msk.f32.vlgmr.msra.gmra.mxu2 %vm447_vm0, %v432_v10  ;;  %2187 = vmatmul.msk.f32.vlgmr.msra.gmra.mxu3 %vm447_vm0, %v433_v11  ;;  %v2263_v16 = vld [vmem:[%s2516_s25 + $0x1e0] sm:$0xff]  ;;  %v2228_v22 = vld [vmem:[%s2516_s25 + $0x148] sm:$0xff]  ;;  %v425_v27 = vld [vmem:[%s2516_s25 + $0x18] sm:$0xff] }
  0x19   : > { %618 = vperm.xlu2 %2351, %v440_v6   ;;  %613 = vperm.xlu1 %2350, %v439_v7   ;;  %v2264_v23 = vld [vmem:[%s2516_s25 + $0x1e8] sm:$0xff]  ;;  %v2191_v28 = vld [vmem:[%s2516_s25 + $0xb0] sm:$0xff]  ;;  %v426_v34 = vld [vmem:[%s2516_s25 + $0x20] sm:$0xff] }
  0x1a   : > { %598 = vperm.xlu0 %2349, %v436_v12   ;;  %992 = vmatpush.msrb.mxu1 %v411_v5  ;;  %v2229_v29 = vld [vmem:[%s2516_s25 + $0x150] sm:$0xff]  ;;  %v2192_v35 = vld [vmem:[%s2516_s25 + $0xb8] sm:$0xff]  ;;  %v2207_v40 = vld [vmem:[%s2500_s29 + $0xc8] sm:$0xff] }
  0x1b   : > { %1741 = vmatpush.msrb.mxu3 %v412_v0  ;;  %1364 = vmatpush.msrb.mxu2 %v411_v5  ;;  %v2265_v30 = vld [vmem:[%s2516_s25 + $0x1f0] sm:$0xff]  ;;  %v2230_v36 = vld [vmem:[%s2516_s25 + $0x158] sm:$0xff]  ;;  %v427_v41 = vld [vmem:[%s2516_s25 + $0x28] sm:$0xff] }
  0x1c   : > { %v2266_v37 = vld [vmem:[%s2516_s25 + $0x1f8] sm:$0xff]  ;;  %v2208_v38 = vld [vmem:[%s2500_s29 + $0xd0] sm:$0xff]  ;;  %v2193_v42 = vld [vmem:[%s2516_s25 + $0xc0] sm:$0xff] }
  0x1d   : > { %1742 = vmatpush.msrb.mxu3 %v411_v5  ;;  %v445_v39 = vld [vmem:[%s2500_s29 + $0x50] sm:$0xff]  ;;  %v2231_v43 = vld [vmem:[%s2516_s25 + $0x160] sm:$0xff]  ;;  %v2241_v45 = vld [vmem:[%s2500_s29 + $0x148] sm:$0xff] }
  0x1e   : > { %2177 = vmatmul.msk.f32.gmra.mxu0 %vm447_vm0, %v423_v13  ;;  %v2267_v44 = vld [vmem:[%s2516_s25 + $0x200] sm:$0xff]  ;;  %v446_v46 = vld [vmem:[%s2500_s29 + $0x58] sm:$0xff]  ;;  %v428_v48 = vld [vmem:[%s2516_s25 + $0x30] sm:$0xff] }
  0x1f   : > { %2214 = vmatmul.msk.f32.vlgmr.msrb.gmra.mxu1 %vm447_vm0, %v2189_v14  ;;  %v2240_v47 = vld [vmem:[%s2500_s29 + $0x140] sm:$0xff]  ;;  %v2194_v49 = vld [vmem:[%s2516_s25 + $0xc8] sm:$0xff]  ;;  %v2243_v52 = vld [vmem:[%s2500_s29 + $0x158] sm:$0xff] }
  0x20   : > { %2250 = vmatmul.msk.f32.vlgmr.msrb.gmra.mxu2 %vm447_vm0, %v2227_v15  ;;  %2286 = vmatmul.msk.f32.vlgmr.msrb.gmra.mxu3 %vm447_vm0, %v2263_v16  ;;  %v2232_v50 = vld [vmem:[%s2516_s25 + $0x168] sm:$0xff]  ;;  %v2209_v53 = vld [vmem:[%s2500_s29 + $0xd8] sm:$0xff]  ;;  %v2242_v54 = vld [vmem:[%s2500_s29 + $0x150] sm:$0xff] }
  0x21   : > { %1080 = vperm.xlu2 %2351, %v2202_v17   ;;  %628 = vperm.xlu1 %2350, %v442_v18   ;;  %v2268_v51 = vld [vmem:[%s2516_s25 + $0x208] sm:$0xff]  ;;  %v429_v55 = vld [vmem:[%s2516_s25 + $0x38] sm:$0xff]  ;;  %v2195_v56 = vld [vmem:[%s2516_s25 + $0xd0] sm:$0xff] }
  0x22   : > { %623 = vperm.xlu0 %2349, %v441_v19   ;;  %v2233_v57 = vld [vmem:[%s2516_s25 + $0x170] sm:$0xff]  ;;  %v2211_v59 = vld [vmem:[%s2500_s29 + $0xe8] sm:$0xff]  ;;  %v2244_v60 = vld [vmem:[%s2500_s29 + $0x160] sm:$0xff] }
  0x23   : > { %v2269_v58 = vld [vmem:[%s2516_s25 + $0x210] sm:$0xff]  ;;  %v2210_v61 = vld [vmem:[%s2500_s29 + $0xe0] sm:$0xff]  ;;  %v2196_v63 = vld [vmem:[%s2516_s25 + $0xd8] sm:$0xff] }
  0x24   : > { %v430_v62 = vld [vmem:[%s2516_s25 + $0x40] sm:$0xff]  ;;  %v2234_v0 = vld [vmem:[%s2516_s25 + $0x178] sm:$0xff]  ;;  %v2277_v2 = vld [vmem:[%s2500_s29 + $0x1e8] sm:$0xff] }
  0x25   : > { %v2270_v1 = vld [vmem:[%s2516_s25 + $0x218] sm:$0xff]  ;;  %v2276_v3 = vld [vmem:[%s2500_s29 + $0x1e0] sm:$0xff]  ;;  %v2245_v4 = vld [vmem:[%s2500_s29 + $0x168] sm:$0xff] }
  0x26   : > { %2178 = vmatmul.msk.f32.gmra.mxu0 %vm447_vm0, %v424_v20  ;;  %v2197_v5 = vld [vmem:[%s2516_s25 + $0xe0] sm:$0xff]  ;;  %v2212_v8 = vld [vmem:[%s2500_s29 + $0xf0] sm:$0xff]  ;;  %v2279_v9 = vld [vmem:[%s2500_s29 + $0x1f8] sm:$0xff] }
  0x27   : > { %2215 = vmatmul.msk.f32.gmra.mxu1 %vm447_vm0, %v2190_v21  ;;  %v2235_v6 = vld [vmem:[%s2516_s25 + $0x180] sm:$0xff]  ;;  %v2278_v10 = vld [vmem:[%s2500_s29 + $0x1f0] sm:$0xff]  ;;  %v2198_v11 = vld [vmem:[%s2516_s25 + $0xe8] sm:$0xff] }
  0x28   : > { %2251 = vmatmul.msk.f32.gmra.mxu2 %vm447_vm0, %v2228_v22  ;;  %2287 = vmatmul.msk.f32.gmra.mxu3 %vm447_vm0, %v2264_v23  ;;  %v2271_v7 = vld [vmem:[%s2516_s25 + $0x220] sm:$0xff]  ;;  %v2236_v12 = vld [vmem:[%s2516_s25 + $0x188] sm:$0xff]  ;;  %v2247_v14 = vld [vmem:[%s2500_s29 + $0x178] sm:$0xff] }
  0x29   : > { %1085 = vperm.xlu2 %2351, %v2203_v24   ;;  %1090 = vperm.xlu1 %2350, %v2204_v25   ;;  %v2272_v13 = vld [vmem:[%s2516_s25 + $0x228] sm:$0xff]  ;;  %v2213_v15 = vld [vmem:[%s2500_s29 + $0xf8] sm:$0xff]  ;;  %v2246_v16 = vld [vmem:[%s2500_s29 + $0x170] sm:$0xff] }
  0x2a   : > { %633 = vperm.xlu0 %2349, %v443_v26   ;;  %v2199_v17 = vld [vmem:[%s2516_s25 + $0xf0] sm:$0xff]  ;;  %v2248_v18 = vld [vmem:[%s2500_s29 + $0x180] sm:$0xff]  ;;  %v2281_v19 = vld [vmem:[%s2500_s29 + $0x208] sm:$0xff] }
  0x2b   : > { %v2280_v20 = vld [vmem:[%s2500_s29 + $0x200] sm:$0xff]  ;;  %v2200_v22 = vld [vmem:[%s2516_s25 + $0xf8] sm:$0xff]  ;;  %v2282_v24 = vld [vmem:[%s2500_s29 + $0x210] sm:$0xff] }
  0x2c   : > { %v2283_v23 = vld [vmem:[%s2500_s29 + $0x218] sm:$0xff]  ;;  %v2249_v25 = vld [vmem:[%s2500_s29 + $0x188] sm:$0xff] }
  0x2e   : > { %2179 = vmatmul.msk.f32.gmra.mxu0 %vm447_vm0, %v425_v27  ;;  %v2285_v27 = vld [vmem:[%s2500_s29 + $0x228] sm:$0xff] }
  0x2f   : > { %2216 = vmatmul.msk.f32.gmra.mxu1 %vm447_vm0, %v2191_v28  ;;  %v2284_v28 = vld [vmem:[%s2500_s29 + $0x220] sm:$0xff] }
  0x30   : > { %2252 = vmatmul.msk.f32.gmra.mxu2 %vm447_vm0, %v2229_v29  ;;  %2288 = vmatmul.msk.f32.gmra.mxu3 %vm447_vm0, %v2265_v30 }
  0x31   : > { %1095 = vperm.xlu2 %2351, %v2205_v31   ;;  %638 = vperm.xlu1 %2350, %v444_v32  }
  0x32   : > { %1100 = vperm.xlu0 %2349, %v2206_v33  }
  0x36   : > { %2180 = vmatmul.msk.f32.gmra.mxu0 %vm447_vm0, %v426_v34 }
  0x37   : > { %2217 = vmatmul.msk.f32.gmra.mxu1 %vm447_vm0, %v2192_v35 }
  0x38   : > { %2253 = vmatmul.msk.f32.gmra.mxu2 %vm447_vm0, %v2230_v36  ;;  %2289 = vmatmul.msk.f32.gmra.mxu3 %vm447_vm0, %v2266_v37  ;;  %v2664_v37 = vld [vmem:[%s3717_s3] ss:$0 sm:$0xff] }
  0x39   : > { %1110 = vperm.xlu2 %2351, %v2208_v38   ;;  %643 = vperm.xlu1 %2350, %v445_v39  }
  0x3a   : > { %1105 = vperm.xlu0 %2349, %v2207_v40  }
  0x3e   : > { %2181 = vmatmul.msk.f32.gmra.mxu0 %vm447_vm0, %v427_v41  ;;  %v2672_v41 = vld [vmem:[%s3718_s4] ss:$0 sm:$0xff] }
  0x3f   : > { %2218 = vmatmul.msk.f32.gmra.mxu1 %vm447_vm0, %v2193_v42 }
  0x40   : > { %2254 = vmatmul.msk.f32.gmra.mxu2 %vm447_vm0, %v2231_v43  ;;  %2290 = vmatmul.msk.f32.gmra.mxu3 %vm447_vm0, %v2267_v44 }
  0x41   : > { %1447 = vperm.xlu2 %2351, %v2241_v45   ;;  %648 = vperm.xlu1 %2350, %v446_v46  }
  0x42   : > { %1442 = vperm.xlu0 %2349, %v2240_v47  }
  0x46   : > { %2182 = vmatmul.msk.f32.gmra.mxu0 %vm447_vm0, %v428_v48 }
  0x47   : > { %2219 = vmatmul.msk.f32.gmra.mxu1 %vm447_vm0, %v2194_v49 }
  0x48   : > { %2255 = vmatmul.msk.f32.gmra.mxu2 %vm447_vm0, %v2232_v50  ;;  %2291 = vmatmul.msk.f32.gmra.mxu3 %vm447_vm0, %v2268_v51 }
  0x49   : > { %1457 = vperm.xlu2 %2351, %v2243_v52   ;;  %1115 = vperm.xlu1 %2350, %v2209_v53  }
  0x4a   : > { %1452 = vperm.xlu0 %2349, %v2242_v54   ;;  %v415_v54 = vld [vmem:[%s3719_s5] sm:$0x1f] }
  0x4e   : > { %2183 = vmatmul.msk.f32.gmra.mxu0 %vm447_vm0, %v429_v55 }
  0x4f   : > { %2220 = vmatmul.msk.f32.gmra.mxu1 %vm447_vm0, %v2195_v56 }
  0x50   : > { %2256 = vmatmul.msk.f32.gmra.mxu2 %vm447_vm0, %v2233_v57  ;;  %2292 = vmatmul.msk.f32.gmra.mxu3 %vm447_vm0, %v2269_v58  ;;  %v417_v58 = vld [vmem:[%s3719_s5 + $0x10] sm:$0x1f] }
  0x51   : > { %1125 = vperm.xlu2 %2351, %v2211_v59   ;;  %1462 = vperm.xlu1 %2350, %v2244_v60   ;;  %v2692_v60 = vperm.slane %v415_v54, 0 }
  0x52   : > { %1120 = vperm.xlu0 %2349, %v2210_v61  }
  0x53   : > { %3779 = vst [vmem:[#allocation5_spill] sm:$0xff] %v2692_v60 }
  0x56   : > { %2184 = vmatmul.msk.f32.gmra.mxu0 %vm447_vm0, %v430_v62  ;;  %v2698_v62 = vld [vmem:[%s3719_s5 + $0x20] sm:$0x1f] }
  0x57   : > { %2221 = vmatmul.msk.f32.gmra.mxu1 %vm447_vm0, %v2196_v63 }
  0x58   : > { %2257 = vmatmul.msk.f32.gmra.mxu2 %vm447_vm0, %v2234_v0  ;;  %2293 = vmatmul.msk.f32.gmra.mxu3 %vm447_vm0, %v2270_v1  ;;  %v2700_v0 = vperm.slane %v415_v54, 2  ;;  %v2702_v1 = vperm.slane %v415_v54, 4 }
  0x59   : > { %1825 = vperm.xlu2 %2351, %v2277_v2   ;;  %1820 = vperm.xlu1 %2350, %v2276_v3  }
  0x5a   : > { %1467 = vperm.xlu0 %2349, %v2245_v4   ;;  %3780 = vst [vmem:[#allocation6_spill] sm:$0xff] %v2700_v0 }
  0x5b   : > { %3781 = vst [vmem:[#allocation7_spill] sm:$0xff] %v2702_v1 }
  0x5f   : > { %2222 = vmatmul.msk.f32.gmra.mxu1 %vm447_vm0, %v2197_v5  ;;  %v2707_v5 = vperm.slane %v415_v54, 3 }
  0x60   : > { %2258 = vmatmul.msk.f32.gmra.mxu2 %vm447_vm0, %v2235_v6  ;;  %2294 = vmatmul.msk.f32.gmra.mxu3 %vm447_vm0, %v2271_v7  ;;  %v2710_v7 = vperm.slane %v417_v58, 2 }
  0x61   : > { %1130 = vperm.xlu2 %2351, %v2212_v8   ;;  %1835 = vperm.xlu1 %2350, %v2279_v9   ;;  %3783 = vst [vmem:[#allocation9_spill] sm:$0xff] %v2707_v5  ;;  %v2716_v9 = vld [vmem:[%s3719_s5 + $0x8] sm:$0x1f] }
  0x62   : > { %1830 = vperm.xlu0 %2349, %v2278_v10   ;;  %3784 = vst [vmem:[#allocation10_spill] sm:$0xff] %v2716_v9 }
  0x67   : > { %2223 = vmatmul.msk.f32.gmra.mxu1 %vm447_vm0, %v2198_v11  ;;  %v2719_v11 = vperm.slane %v2698_v62, 2 }
  0x68   : > { %2259 = vmatmul.msk.f32.gmra.mxu2 %vm447_vm0, %v2236_v12  ;;  %2295 = vmatmul.msk.f32.gmra.mxu3 %vm447_vm0, %v2272_v13  ;;  %v2721_v12 = vperm.slane %v417_v58, 4  ;;  %v2724_v13 = vperm.slane %v2698_v62, 4 }
  0x69   : > { %1477 = vperm.xlu2 %2351, %v2247_v14   ;;  %1135 = vperm.xlu1 %2350, %v2213_v15  }
  0x6a   : > { %1472 = vperm.xlu0 %2349, %v2246_v16  }
  0x6b   : > { %v2638_v21 = vpop.permute.xlu2 %608 }
  0x6f   : > { %2224 = vmatmul.msk.f32.gmra.mxu1 %vm447_vm0, %v2199_v17  ;;  %v2726_v17 = vperm.slane %v415_v54, 1 }
  0x71   : > { %1482 = vperm.xlu2 %2351, %v2248_v18   ;;  %1845 = vperm.xlu1 %2350, %v2281_v19   ;;  %3785 = vst [vmem:[#allocation11_spill] sm:$0xff] %v2726_v17  ;;  %v2728_v19 = vperm.slane %v417_v58, 0 }
  0x72   : > { %1840 = vperm.xlu0 %2349, %v2280_v20  }
  0x73   : > { %v2645_v26 = vpop.permute.xlu2 %618  ;;  %3786 = vst [vmem:[#allocation12_spill] sm:$0xff] %v2728_v19 }
  0x77   : > { %2225 = vmatmul.msk.f32.gmra.mxu1 %vm447_vm0, %v2200_v22 }
  0x79   : > { %1855 = vperm.xlu2 %2351, %v2283_v23   ;;  %1850 = vperm.xlu1 %2350, %v2282_v24   ;;  %v2732_v23 = vperm.slane %v2716_v9, 2  ;;  %v2735_v24 = vperm.slane %v2698_v62, 0 }
  0x7a   : > { %1487 = vperm.xlu0 %2349, %v2249_v25  }
  0x7b   : > { %v2651_v30 = vpop.permute.xlu2 %1080 }
  0x81   : > { %1865 = vperm.xlu1 %2350, %v2285_v27  }
  0x82   : > { %1860 = vperm.xlu0 %2349, %v2284_v28  }
  0x83   : > { %v2649_v29 = vpop.permute.xlu1 %603  ;;  %v2655_v33 = vpop.permute.xlu2 %1085 }
  0x84   : > { %v594_v31 = vpop.permute.xlu0 %593 }
  0x8b   : > { %v2653_v32 = vpop.permute.xlu1 %613  ;;  %v2666_v39 = vpop.permute.xlu2 %1095 }
  0x8c   : > { %v2657_v34 = vpop.permute.xlu0 %598 }
  0x93   : > { %v501_v35 = vpop.f32.mrf.mxu0  ;;  %v2659_v36 = vpop.permute.xlu1 %628 }
  0x94   : > { %3776 = vst [vmem:[#allocation2_spill] sm:$0xff] %v2659_v36  ;;  %v528_v38 = vpop.f32.mrf.mxu1  ;;  %v540_v40 = vmul.f32 %v2664_v37, %v501_v35  ;;  %v2674_v43 = vpop.permute.xlu0 %623 }
  0x95   : > { %3777 = vst [vmem:[#allocation3_spill] sm:$0xff] %v2674_v43  ;;  %v549_v49 = vmul.f32 %v2664_v37, %v528_v38  ;;  %v2682_v53 = vpop.permute.xlu2 %1110  ;;  %v2741_v38 = vperm.slane %v2716_v9, 4 }
  0x96   : > { %v555_v44 = vadd.f32 %v2672_v41, %v540_v40  ;;  %3778 = vst [vmem:[#allocation4_spill] sm:$0xff] %v2682_v53 }
  0x97   : > { %v564_v57 = vadd.f32 %v2672_v41, %v549_v49 }
  0x98   : > { %v567_v50 = vmax.f32 %v555_v44, 0.0 }
  0x99   : > { %v576_v10 = vmax.f32 %v564_v57, 0.0 }
  0x9a   : > { %v579_v59 = vmin.f32 %v567_v50, 6.0 }
  0x9b   : > { %v531_v42 = vpop.f32.mrf.mxu2  ;;  %v504_v45 = vpop.f32.mrf.mxu0 }
  0x9c   : > { %v541_v46 = vmul.f32 %v2664_v37, %v504_v45  ;;  %v994_v47 = vpop.f32.mrf.mxu1  ;;  %v2678_v48 = vpop.permute.xlu1 %1090  ;;  %v550_v2 = vmul.f32 %v2664_v37, %v531_v42  ;;  %v651_v15 = vmul.f32 %v594_v31, %v579_v59  ;;  %v588_v42 = vmin.f32 %v576_v10, 6.0 }
  0x9d   : > { %v534_v51 = vpop.f32.mrf.mxu3  ;;  %v1030_v52 = vmul.f32 %v2664_v37, %v994_v47  ;;  %v2705_v3 = vpop.permute.xlu0 %633  ;;  %v2746_v45 = vperm.slane %v417_v58, 1 }
  0x9e   : > { %v556_v55 = vadd.f32 %v2672_v41, %v541_v46  ;;  %3782 = vst [vmem:[#allocation8_spill] sm:$0xff] %v2705_v3  ;;  %v551_v6 = vmul.f32 %v2664_v37, %v534_v51  ;;  %v565_v20 = vadd.f32 %v2672_v41, %v550_v2  ;;  %v2743_v40 = vpop.permute.xlu2 %1447  ;;  %v2748_v46 = vperm.slane %v417_v58, 3 }
  0x9f   : > { %v1042_v61 = vadd.f32 %v2672_v41, %v1030_v52  ;;  %3787 = vst [vmem:[#allocation13_spill] sm:$0xff] %v2746_v45  ;;  %v2751_v47 = vmul.f32 %v2700_v0, %v651_v15  ;;  %v2754_v49 = vmul.f32 %v2702_v1, %v651_v15  ;;  %v2758_v54 = vmul.f32 %v2692_v60, %v651_v15 }
  0xa0   : > { %v568_v4 = vmax.f32 %v556_v55, 0.0  ;;  %v566_v25 = vadd.f32 %v2672_v41, %v551_v6  ;;  %3788 = vst [vmem:[#allocation14_spill] sm:$0xff] %v2748_v46  ;;  %v577_v57 = vmax.f32 %v565_v20, 0.0 }
  0xa1   : > { %v1054_v16 = vmax.f32 %v1042_v61, 0.0  ;;  %v820_v15 = vrot.slane %v2754_v49, 2 }
  0xa2   : > { %v580_v22 = vmin.f32 %v568_v4, 6.0  ;;  %v578_v2 = vmax.f32 %v566_v25, 0.0  ;;  %v589_v25 = vmin.f32 %v577_v57, 6.0 }
  0xa3   : > { %v1366_v56 = vpop.f32.mrf.mxu2  ;;  %v507_v63 = vpop.f32.mrf.mxu0  ;;  %v1066_v50 = vmin.f32 %v1054_v16, 6.0 }
  0xa4   : > { %v542_v8 = vmul.f32 %v2664_v37, %v507_v63  ;;  %v997_v14 = vpop.f32.mrf.mxu1  ;;  %v639_v18 = vpop.permute.xlu1 %638  ;;  %v652_v55 = vmul.f32 %v2657_v34, %v580_v22  ;;  %v1400_v58 = vmul.f32 %v2664_v37, %v1366_v56  ;;  %v708_v34 = vrot.slane %v2751_v47, 1 }
  0xa5   : > { %v1744_v27 = vpop.f32.mrf.mxu3  ;;  %v1031_v31 = vmul.f32 %v2664_v37, %v997_v14  ;;  %v660_v6 = vmul.f32 %v639_v18, %v588_v42  ;;  %v1138_v16 = vmul.f32 %v2651_v30, %v1066_v50  ;;  %v2772_v56 = vperm.slane %v2716_v9, 3 }
  0xa6   : > { %v557_v28 = vadd.f32 %v2672_v41, %v542_v8  ;;  %v1778_v4 = vmul.f32 %v2664_v37, %v1744_v27  ;;  %v2765_v8 = vpop.permute.xlu0 %1100  ;;  %v692_v20 = vmul.f32 %v2700_v0, %v652_v55  ;;  %v804_v22 = vmul.f32 %v2702_v1, %v652_v55 }
  0xa7   : > { %v1043_v51 = vadd.f32 %v2672_v41, %v1031_v31  ;;  %v2777_v18 = vperm.slane %v2716_v9, 0  ;;  %v1410_v27 = vadd.f32 %v2672_v41, %v1400_v58  ;;  %v2786_v47 = vmul.f32 %v2710_v7, %v660_v6 }
  0xa8   : > { %v569_v61 = vmax.f32 %v557_v28, 0.0  ;;  %v2783_v30 = vadd.f32 %v2672_v41, %v1778_v4  ;;  %v2795_v55 = vmul.f32 %v2721_v12, %v660_v6  ;;  %v2798_v57 = vmul.f32 %v2724_v13, %v660_v6 }
  0xa9   : > { %v1055_v10 = vmax.f32 %v1043_v51, 0.0  ;;  %3789 = vst [vmem:[#allocation15_spill] sm:$0xff] %v2777_v18  ;;  %v2789_v51 = vmul.f32 %v2707_v5, %v1138_v16  ;;  %v709_v58 = vrot.slane %v692_v20, 1  ;;  %v1420_v3 = vmax.f32 %v1410_v27, 0.0 }
  0xaa   : > { %v581_v28 = vmin.f32 %v569_v61, 6.0  ;;  %3790 = vst [vmem:[#allocation16_spill] sm:$0xff] %v2783_v30  ;;  %v821_v61 = vrot.slane %v804_v22, 2 }
  0xab   : > { %v1369_v35 = vpop.f32.mrf.mxu2  ;;  %v510_v52 = vpop.f32.mrf.mxu0  ;;  %3791 = vst [vmem:[#allocation17_spill] sm:$0xff] %v2786_v47  ;;  %v1067_v49 = vmin.f32 %v1055_v10, 6.0  ;;  %v2804_v10 = vmul.f32 %v2726_v17, %v1138_v16  ;;  %v1194_v16 = vrot.slane %v2789_v51, 1 }
  0xac   : > { %v1401_v44 = vmul.f32 %v2664_v37, %v1369_v35  ;;  %v543_v59 = vmul.f32 %v2664_v37, %v510_v52  ;;  %v644_v35 = vpop.permute.xlu1 %643  ;;  %v1000_v42 = vpop.f32.mrf.mxu1  ;;  %v2792_v52 = vmul.f32 %v2719_v11, %v660_v6  ;;  %3793 = vst [vmem:[#allocation19_spill] sm:$0xff] %v2795_v55 }
  0xad   : > { %3794 = vst [vmem:[#allocation20_spill] sm:$0xff] %v2798_v57  ;;  %v1032_v4 = vmul.f32 %v2664_v37, %v1000_v42  ;;  %v1139_v6 = vmul.f32 %v2655_v33, %v1067_v49  ;;  %v2009_v33 = vld [vmem:[%s3722_s8 + $0x78] sm:$0xff] }
  0xae   : > { %v1411_v63 = vadd.f32 %v2672_v41, %v1401_v44  ;;  %v558_v14 = vadd.f32 %v2672_v41, %v543_v59  ;;  %v2780_v44 = vmin.f32 %v578_v2, 6.0  ;;  %3792 = vst [vmem:[#allocation18_spill] sm:$0xff] %v2792_v52  ;;  %v1747_v59 = vpop.f32.mrf.mxu3  ;;  %v661_v2 = vmul.f32 %v644_v35, %v589_v25  ;;  %v2813_v25 = vld [vmem:[%s3719_s5 + $0x18] sm:$0x1f]  ;;  %v2831_v49 = vpop.permute.xlu0 %1105  ;;  %2010 = vmatpush.msrb.mxu0 %v2009_v33 }
  0xaf   : > { %v1779_v36 = vmul.f32 %v2664_v37, %v1747_v59  ;;  %3795 = vst [vmem:[#allocation21_spill] sm:$0xff] %v2813_v25  ;;  %v2843_v27 = vperm.slane %v2813_v25, 2 }
  0xb0   : > { %v1421_v31 = vmax.f32 %v1411_v63, 0.0  ;;  %v570_v50 = vmax.f32 %v558_v14, 0.0  ;;  %v2800_v63 = vpop.permute.xlu2 %1457  ;;  %v653_v14 = vmul.f32 %v2649_v29, %v581_v28  ;;  %v2823_v28 = vsel %vm707_vm1, %v708_v34, %v709_v58  ;;  %3796 = vst [vmem:[#allocation22_spill] sm:$0xff] %v2831_v49 }
  0xb1   : > { %v2829_v42 = vmul.f32 %v2719_v11, %v661_v2  ;;  %v2837_v9 = vmul.f32 %v2724_v13, %v661_v2  ;;  %v1430_v34 = vmin.f32 %v1420_v3, 6.0  ;;  %v1789_v58 = vadd.f32 %v2672_v41, %v1779_v36 }
  0xb2   : > { %v1431_v53 = vmin.f32 %v1421_v31, 6.0  ;;  %v582_v20 = vmin.f32 %v570_v50, 6.0  ;;  %v2826_v31 = vsel %vm819_vm2, %v820_v15, %v821_v61  ;;  %v1044_v50 = vadd.f32 %v2672_v41, %v1032_v4 }
  0xb3   : > { %v513_v22 = vpop.f32.mrf.mxu0  ;;  %v1372_v51 = vpop.f32.mrf.mxu2  ;;  %v673_v59 = vmul.f32 %v2728_v19, %v653_v14  ;;  %v1179_v15 = vmul.f32 %v2707_v5, %v1139_v6  ;;  %v2846_v4 = vmul.f32 %v2692_v60, %v653_v14  ;;  %v2849_v33 = vmul.f32 %v2735_v24, %v661_v2 }
  0xb4   : > { %v1491_v29 = vmul.f32 %v2743_v40, %v1431_v53  ;;  %v654_v61 = vmul.f32 %v2638_v21, %v582_v20  ;;  %v693_v53 = vmul.f32 %v2700_v0, %v653_v14  ;;  %v729_v40 = vmul.f32 %v2710_v7, %v653_v14  ;;  %v1003_v47 = vpop.f32.mrf.mxu1 }
  0xb5   : > { %3797 = vst [vmem:[#allocation23_spill] sm:$0xff] %v2846_v4  ;;  %v805_v6 = vmul.f32 %v2702_v1, %v653_v14  ;;  %v841_v36 = vmul.f32 %v2721_v12, %v653_v14  ;;  %v1056_v21 = vmax.f32 %v1044_v50, 0.0  ;;  %v2857_v20 = vadd.f32 %v673_v59, %v2758_v54 }
  0xb6   : > { %3798 = vst [vmem:[#allocation24_spill] sm:$0xff] %v2849_v33  ;;  %v2860_v35 = vmul.f32 %v2732_v23, %v1491_v29  ;;  %v2863_v2 = vmul.f32 %v2741_v38, %v1491_v29  ;;  %v1195_v33 = vrot.slane %v1179_v15, 1  ;;  %v694_v3 = vmul.f32 %v2700_v0, %v654_v61  ;;  %v1750_v15 = vpop.f32.mrf.mxu3 }
  0xb7   : > { %v730_v14 = vmul.f32 %v2710_v7, %v654_v61  ;;  %v806_v50 = vmul.f32 %v2702_v1, %v654_v61  ;;  %v711_v54 = vrot.slane %v693_v53, 1  ;;  %v745_v59 = vrot.slane %v729_v40, 1  ;;  %v649_v1 = vpop.permute.xlu1 %648 }
  0xb8   : > { %3799 = vst [vmem:[#allocation25_spill] sm:$0xff] %v2863_v2  ;;  %v2866_v57 = vpop.permute.xlu2 %1125  ;;  %v842_v52 = vmul.f32 %v2721_v12, %v654_v61  ;;  %v544_v60 = vmul.f32 %v2664_v37, %v513_v22  ;;  %v823_v29 = vrot.slane %v805_v6, 2  ;;  %v857_v4 = vrot.slane %v841_v36, 2  ;;  %v1443_v36 = vpop.permute.xlu0 %1442 }
  0xb9   : > { %3800 = vst [vmem:[#allocation26_spill] sm:$0xff] %v2866_v57  ;;  %v1068_v19 = vmin.f32 %v1056_v21, 6.0  ;;  %v1402_v55 = vmul.f32 %v2664_v37, %v1372_v51  ;;  %v1780_v25 = vmul.f32 %v2664_v37, %v1750_v15  ;;  %v2879_v61 = vsel %vm707_vm1, %v1194_v16, %v1195_v33 }
  0xba   : > { %v559_v53 = vadd.f32 %v2672_v41, %v544_v60  ;;  %v712_v22 = vrot.slane %v694_v3, 1  ;;  %v746_v40 = vrot.slane %v730_v14, 1  ;;  %v824_v6 = vrot.slane %v806_v50, 2 }
  0xbb   : > { %v516_v30 = vpop.f32.mrf.mxu0  ;;  %v1375_v21 = vpop.f32.mrf.mxu2  ;;  %v858_v51 = vrot.slane %v842_v52, 2  ;;  %v1799_v0 = vmax.f32 %v1789_v58, 0.0  ;;  %v1140_v43 = vmul.f32 %v2678_v48, %v1068_v19  ;;  %v1412_v15 = vadd.f32 %v2672_v41, %v1402_v55 }
  0xbc   : > { %v571_v49 = vmax.f32 %v559_v53, 0.0  ;;  %v545_v57 = vmul.f32 %v2664_v37, %v516_v30  ;;  %v662_v2 = vmul.f32 %v649_v1, %v2780_v44  ;;  %v1033_v60 = vmul.f32 %v2664_v37, %v1003_v47  ;;  %v2008_v1 = vld [vmem:[%s3722_s8 + $0x70] sm:$0xff] }
  0xbd   : > { %v1490_v16 = vmul.f32 %v1443_v36, %v1430_v34  ;;  %v1403_v3 = vmul.f32 %v2664_v37, %v1375_v21  ;;  %v2889_v52 = vsel %vm707_vm1, %v711_v54, %v712_v22  ;;  %v747_v58 = vsel %vm707_vm1, %v745_v59, %v746_v40  ;;  %2011 = vmatpush.msrb.mxu0 %v2008_v1 }
  0xbe   : > { %v583_v33 = vmin.f32 %v571_v49, 6.0  ;;  %v560_v14 = vadd.f32 %v2672_v41, %v545_v57  ;;  %v2893_v30 = vsel %vm819_vm2, %v823_v29, %v824_v6  ;;  %v2896_v48 = vadd.f32 %v2672_v41, %v1780_v25  ;;  %v1006_v57 = vpop.f32.mrf.mxu1 }
  0xbf   : > { %v2902_v19 = vsel %vm819_vm2, %v857_v4, %v858_v51  ;;  %v1809_v44 = vmin.f32 %v1799_v0, 6.0  ;;  %v2908_v49 = vmul.f32 %v2707_v5, %v1140_v43  ;;  %v773_v25 = vmul.f32 %v2719_v11, %v662_v2 }
  0xc0   : > { %v2905_v47 = vmul.f32 %v2653_v32, %v583_v33  ;;  %v572_v55 = vmax.f32 %v560_v14, 0.0  ;;  %v1826_v34 = vpop.permute.xlu2 %1825  ;;  %v885_v50 = vmul.f32 %v2724_v13, %v662_v2  ;;  %v1045_v54 = vadd.f32 %v2672_v41, %v1033_v60  ;;  %v1753_v2 = vpop.f32.mrf.mxu3 }
  0xc1   : > { %v1519_v4 = vmul.f32 %v2732_v23, %v1490_v16  ;;  %v1413_v0 = vadd.f32 %v2672_v41, %v1403_v3  ;;  %v2918_v29 = vmul.f32 %v2726_v17, %v1140_v43  ;;  %v2921_v53 = vmul.f32 %v2748_v46, %v1140_v43 }
  0xc2   : > { %v584_v59 = vmin.f32 %v572_v55, 6.0  ;;  %v682_v32 = vmul.f32 %v2735_v24, %v2905_v47  ;;  %v2924_v22 = vmul.f32 %v2741_v38, %v1490_v16  ;;  %v1034_v40 = vmul.f32 %v2664_v37, %v1006_v57 }
  0xc3   : > { %v2928_v6 = vmul.f32 %v2746_v45, %v1140_v43  ;;  %v1869_v36 = vmul.f32 %v1826_v34, %v1809_v44  ;;  %v1422_v21 = vmax.f32 %v1412_v15, 0.0  ;;  %v792_v60 = vrot.slane %v773_v25, 1 }
  0xc4   : > { %v2931_v51 = vmul.f32 %v2645_v26, %v584_v59  ;;  %v904_v33 = vrot.slane %v885_v50, 2  ;;  %v2934_v3 = vmul.f32 %v2777_v18, %v1490_v16  ;;  %v1057_v14 = vmax.f32 %v1045_v54, 0.0  ;;  %v1378_v54 = vpop.f32.mrf.mxu2 }
  0xc5   : > { %v1535_v55 = vrot.slane %v1519_v4, 1  ;;  %v1423_v17 = vmax.f32 %v1413_v0, 0.0  ;;  %v686_v57 = vadd.f32 %v682_v32, %v2857_v20  ;;  %v766_v26 = vmul.f32 %v2719_v11, %v2905_v47 }
  0xc6   : > { %v1046_v15 = vadd.f32 %v2672_v41, %v1034_v40  ;;  %v2944_v34 = vmul.f32 %v2772_v56, %v1869_v36  ;;  %v1432_v16 = vmin.f32 %v1422_v21, 6.0  ;;  %v767_v50 = vmul.f32 %v2719_v11, %v2931_v51  ;;  %v1453_v36 = vpop.permute.xlu0 %1452 }
  0xc7   : > { %v724_v25 = vadd.f32 %v2823_v28, %v686_v57  ;;  %v3801_v20 = vrot.slane %v2829_v42, 1  ;;  %v3803_v0 = vrot.slane %v2837_v9, 2  ;;  %v1069_v32 = vmin.f32 %v1057_v14, 6.0 }
  0xc8   : > { %v1781_v40 = vmul.f32 %v2664_v37, %v1753_v2  ;;  %v3805_v28 = vrot.slane %v2860_v35, 1  ;;  %v1433_v57 = vmin.f32 %v1423_v17, 6.0  ;;  %v782_v44 = vrot.slane %v766_v26, 1  ;;  %v519_v17 = vpop.f32.mrf.mxu0 }
  0xc9   : > { %v2952_v4 = vsel %vm707_vm1, %v3801_v20, %v792_v60  ;;  %v2957_v59 = vsel %vm819_vm2, %v3803_v0, %v904_v33  ;;  %v783_v42 = vrot.slane %v767_v50, 1  ;;  %v761_v43 = vadd.f32 %v747_v58, %v724_v25  ;;  %v1009_v20 = vpop.f32.mrf.mxu1  ;;  %v1756_v50 = vpop.f32.mrf.mxu3 }
  0xca   : > { %3802 = vst [vmem:[#allocation27_spill] sm:$0xff] %v2952_v4  ;;  %v2963_v21 = vsel %vm707_vm1, %v1535_v55, %v3805_v28  ;;  %v879_v60 = vmul.f32 %v2724_v13, %v2931_v51  ;;  %v1058_v9 = vmax.f32 %v1046_v15, 0.0  ;;  %v1404_v33 = vmul.f32 %v2664_v37, %v1378_v54  ;;  %v2994_v28 = vpop.permute.xlu1 %1115 }
  0xcb   : > { %3804 = vst [vmem:[#allocation28_spill] sm:$0xff] %v2957_v59  ;;  %v2969_v2 = vmul.f32 %v1453_v36, %v1432_v16  ;;  %v784_v35 = vsel %vm707_vm1, %v782_v44, %v783_v42  ;;  %v878_v55 = vmul.f32 %v2724_v13, %v2905_v47  ;;  %v1141_v26 = vmul.f32 %v2666_v39, %v1069_v32  ;;  %v2007_v16 = vld [vmem:[%s3722_s8 + $0x68] sm:$0xff] }
  0xcc   : > { %v2976_v58 = vadd.f32 %v2672_v41, %v1781_v40  ;;  %v798_v25 = vadd.f32 %v784_v35, %v761_v43  ;;  %v2979_v15 = vperm.slane %v2698_v62, 1  ;;  %v2985_v44 = vmul.f32 %v2800_v63, %v1433_v57  ;;  %2012 = vmatpush.msrb.mxu0 %v2007_v16  ;;  %3807 = vst [vmem:[#allocation30_spill] sm:$0xff] %v2994_v28 }
  0xcd   : > { %v895_v54 = vrot.slane %v879_v60, 2  ;;  %v2988_v0 = vmul.f32 %v2664_v37, %v1756_v50  ;;  %v1035_v39 = vmul.f32 %v2664_v37, %v1009_v20  ;;  %v1070_v32 = vmin.f32 %v1058_v9, 6.0 }
  0xce   : > { %3806 = vst [vmem:[#allocation29_spill] sm:$0xff] %v2979_v15  ;;  %v836_v43 = vadd.f32 %v2826_v31, %v798_v25  ;;  %v1414_v40 = vadd.f32 %v2672_v41, %v1404_v33  ;;  %v546_v36 = vmul.f32 %v2664_v37, %v519_v17  ;;  %v2998_v63 = vmul.f32 %v2732_v23, %v2969_v2 }
  0xcf   : > { %v3002_v57 = vmul.f32 %v2741_v38, %v2969_v2  ;;  %v894_v42 = vrot.slane %v878_v55, 2  ;;  %v1047_v60 = vadd.f32 %v2672_v41, %v1035_v39  ;;  %v1181_v31 = vmul.f32 %v2707_v5, %v1141_v26 }
  0xd0   : > { %3808 = vst [vmem:[#allocation31_spill] sm:$0xff] %v2998_v63  ;;  %v3008_v9 = vmul.f32 %v2777_v18, %v2969_v2  ;;  %v731_v33 = vmul.f32 %v2710_v7, %v2905_v47  ;;  %v873_v20 = vadd.f32 %v2902_v19, %v836_v43  ;;  %v1216_v35 = vmul.f32 %v2748_v46, %v1141_v26 }
  0xd1   : > { %3809 = vst [vmem:[#allocation32_spill] sm:$0xff] %v3002_v57  ;;  %v3016_v17 = vmul.f32 %v2732_v23, %v2985_v44  ;;  %v896_v55 = vsel %vm819_vm2, %v894_v42, %v895_v54  ;;  %v1059_v25 = vmax.f32 %v1047_v60, 0.0  ;;  %v3021_v50 = vmul.f32 %v2843_v27, %v2985_v44  ;;  %v1381_v42 = vpop.f32.mrf.mxu2 }
  0xd2   : > { %3810 = vst [vmem:[#allocation33_spill] sm:$0xff] %v3008_v9  ;;  %v3024_v16 = vmul.f32 %v2765_v8, %v1070_v32  ;;  %v561_v39 = vadd.f32 %v2672_v41, %v546_v36  ;;  %v910_v14 = vadd.f32 %v896_v55, %v873_v20  ;;  %v3029_v19 = vmul.f32 %v2741_v38, %v2985_v44  ;;  %v2006_v32 = vld [vmem:[%s3722_s8 + $0x60] sm:$0xff] }
  0xd3   : > { %3811 = vst [vmem:[#allocation34_spill] sm:$0xff] %v3016_v17  ;;  %v1071_v54 = vmin.f32 %v1059_v25, 6.0  ;;  %v1198_v60 = vrot.slane %v1181_v31, 1  ;;  %v732_v1 = vmul.f32 %v2710_v7, %v2931_v51  ;;  %v1424_v59 = vmax.f32 %v1414_v40, 0.0  ;;  %v3814_v55 = vld [vmem:[#allocation22_spill] sm:$0xff]  ;;  %2013 = vmatpush.msrb.mxu0 %v2006_v32 }
  0xd4   : > { %3812 = vst [vmem:[#allocation35_spill] sm:$0xff] %v3024_v16  ;;  %v1155_v8 = vadd.f32 %v2804_v10, %v910_v14  ;;  %v1232_v36 = vrot.slane %v1216_v35, 1  ;;  %v844_v20 = vmul.f32 %v2721_v12, %v2931_v51  ;;  %v3043_v25 = vperm.slane %v2698_v62, 3  ;;  %v3816_v62 = vld [vmem:[#allocation6_spill] sm:$0xff]  ;;  %v1463_v35 = vpop.permute.xlu1 %1462 }
  0xd5   : > { %3813 = vst [vmem:[#allocation36_spill] sm:$0xff] %v3029_v19  ;;  %v1143_v26 = vmul.f32 %v3814_v55, %v1071_v54  ;;  %v1169_v31 = vmul.f32 %v2979_v15, %v3024_v16  ;;  %v573_v40 = vmax.f32 %v561_v39, 0.0  ;;  %v1405_v14 = vmul.f32 %v2664_v37, %v1381_v42  ;;  %v3817_v42 = vld [vmem:[#allocation7_spill] sm:$0xff]  ;;  %v522_v19 = vpop.f32.mrf.mxu0 }
  0xd6   : > { %3815 = vst [vmem:[#allocation22_spill] sm:$0xff] %v3043_v25  ;;  %v1164_v10 = vadd.f32 %v2928_v6, %v1155_v8  ;;  %v843_v57 = vmul.f32 %v2721_v12, %v2905_v47  ;;  %v3056_v32 = vmul.f32 %v3816_v62, %v2931_v51  ;;  %v749_v55 = vrot.slane %v732_v1, 1 }
  0xd7   : > { %v1253_v54 = vmul.f32 %v3043_v25, %v1143_v26  ;;  %v1434_v63 = vmin.f32 %v1424_v59, 6.0  ;;  %v3061_v8 = vmul.f32 %v3817_v42, %v2931_v51  ;;  %v861_v43 = vrot.slane %v844_v20, 2 }
  0xd8   : > { %v1173_v39 = vadd.f32 %v1169_v31, %v1164_v10  ;;  %v1252_v17 = vmul.f32 %v3043_v25, %v3024_v16  ;;  %v748_v4 = vrot.slane %v731_v33, 1  ;;  %v585_v18 = vmin.f32 %v573_v40, 6.0  ;;  %v3075_v10 = vpop.permute.xlu0 %1120  ;;  %v3831_v33 = vld [vmem:[#allocation12_spill] sm:$0xff] }
  0xd9   : > { %3818 = vst [vmem:[#allocation6_spill] sm:$0xff] %v3061_v8  ;;  %v1415_v28 = vadd.f32 %v2672_v41, %v1405_v14  ;;  %v3819_v1 = vrot.slane %v2908_v49, 1  ;;  %v3821_v31 = vrot.slane %v2921_v53, 1  ;;  %v860_v20 = vrot.slane %v843_v57, 2 }
  0xda   : > { %v1210_v9 = vadd.f32 %v2879_v61, %v1173_v39  ;;  %3822 = vst [vmem:[#allocation37_spill] sm:$0xff] %v3075_v10  ;;  %v1269_v6 = vrot.slane %v1253_v54, 1  ;;  %v3079_v61 = vsel %vm707_vm1, %v748_v4, %v749_v55  ;;  %v3081_v40 = vmul.f32 %v1463_v35, %v1434_v63  ;;  %v3826_v39 = vld [vmem:[#allocation3_spill] sm:$0xff] }
  0xdb   : > { %v3070_v59 = vsel %vm707_vm1, %v3819_v1, %v1198_v60  ;;  %v1233_v51 = vsel %vm707_vm1, %v3821_v31, %v1232_v36  ;;  %v3085_v14 = vsel %vm819_vm2, %v860_v20, %v861_v43  ;;  %v3089_v53 = vadd.f32 %v2672_v41, %v2988_v0  ;;  %v3824_v36 = vld [vmem:[#allocation21_spill] sm:$0xff]  ;;  %v3832_v10 = vld [vmem:[#allocation23_spill] sm:$0xff] }
  0xdc   : > { %3820 = vst [vmem:[#allocation7_spill] sm:$0xff] %v3070_v59  ;;  %v1247_v49 = vadd.f32 %v1233_v51, %v1210_v9  ;;  %v1268_v57 = vrot.slane %v1252_v17, 1  ;;  %v3092_v54 = vperm.slane %v3824_v36, 0  ;;  %v3095_v1 = vmul.f32 %v3826_v39, %v585_v18 }
  0xdd   : > { %3823 = vst [vmem:[#allocation38_spill] sm:$0xff] %v3089_v53  ;;  %v1425_v4 = vmax.f32 %v1415_v28, 0.0  ;;  %v547_v63 = vmul.f32 %v2664_v37, %v522_v19  ;;  %v3100_v9 = vmul.f32 %v2746_v45, %v3024_v16  ;;  %v1182_v43 = vmul.f32 %v2707_v5, %v3024_v16  ;;  %v3829_v28 = vld [vmem:[#allocation16_spill] sm:$0xff] }
  0xde   : > { %3825 = vst [vmem:[#allocation21_spill] sm:$0xff] %v3092_v54  ;;  %v1217_v0 = vmul.f32 %v2748_v46, %v3024_v16  ;;  %v1270_v17 = vsel %vm707_vm1, %v1268_v57, %v1269_v6  ;;  %v3109_v35 = vmul.f32 %v3092_v54, %v3081_v40  ;;  %v1798_v55 = vmax.f32 %v3829_v28, 0.0  ;;  %v1759_v6 = vpop.f32.mrf.mxu3 }
  0xdf   : > { %3827 = vst [vmem:[#allocation3_spill] sm:$0xff] %v3100_v9  ;;  %v1284_v18 = vadd.f32 %v1270_v17, %v1247_v49  ;;  %v562_v19 = vadd.f32 %v2672_v41, %v547_v63  ;;  %v1183_v31 = vmul.f32 %v2707_v5, %v1143_v26  ;;  %v1218_v51 = vmul.f32 %v2748_v46, %v1143_v26  ;;  %v3833_v9 = vld [vmem:[#allocation2_spill] sm:$0xff] }
  0xe0   : > { %3828 = vst [vmem:[#allocation39_spill] sm:$0xff] %v3109_v35  ;;  %v1556_v20 = vmul.f32 %v2843_v27, %v2969_v2  ;;  %v3118_v39 = vperm.slane %v3824_v36, 4  ;;  %v1435_v57 = vmin.f32 %v1425_v4, 6.0  ;;  %v674_v49 = vmul.f32 %v3831_v33, %v2905_v47  ;;  %v1821_v35 = vpop.permute.xlu1 %1820 }
  0xe1   : > { %v574_v60 = vmax.f32 %v562_v19, 0.0  ;;  %v683_v17 = vmul.f32 %v2735_v24, %v3095_v1  ;;  %v1200_v63 = vrot.slane %v1182_v43, 1  ;;  %v1783_v28 = vmul.f32 %v2664_v37, %v1759_v6  ;;  %v1468_v6 = vpop.permute.xlu0 %1467 }
  0xe2   : > { %3830 = vst [vmem:[#allocation16_spill] sm:$0xff] %v3118_v39  ;;  %v1510_v26 = vmul.f32 %v3092_v54, %v2969_v2  ;;  %v1631_v53 = vmul.f32 %v3118_v39, %v2985_v44  ;;  %v1505_v45 = vadd.f32 %v2934_v3, %v1284_v18  ;;  %v1808_v4 = vmin.f32 %v1798_v55, 6.0 }
  0xe3   : > { %v586_v19 = vmin.f32 %v574_v60, 6.0  ;;  %v678_v16 = vadd.f32 %v674_v49, %v3832_v10  ;;  %v1201_v5 = vrot.slane %v1183_v31, 1  ;;  %v1235_v8 = vrot.slane %v1218_v51, 1  ;;  %v3834_v60 = vld [vmem:[#allocation25_spill] sm:$0xff] }
  0xe4   : > { %v1572_v59 = vrot.slane %v1556_v20, 1  ;;  %v1630_v43 = vmul.f32 %v3118_v39, %v2969_v2  ;;  %v1868_v25 = vmul.f32 %v1821_v35, %v1808_v4  ;;  %v1495_v46 = vmul.f32 %v1468_v6, %v1435_v57  ;;  %v3838_v57 = vld [vmem:[#allocation10_spill] sm:$0xff] }
  0xe5   : > { %v3134_v54 = vmul.f32 %v3833_v9, %v586_v19  ;;  %v687_v15 = vadd.f32 %v683_v17, %v678_v16  ;;  %v1234_v44 = vrot.slane %v1217_v0, 1  ;;  %v3137_v3 = vadd.f32 %v2672_v41, %v1783_v28  ;;  %v1012_v17 = vpop.f32.mrf.mxu1 }
  0xe6   : > { %v3835_v18 = vrot.slane %v3834_v60, 2  ;;  %v3836_v10 = vrot.slane %v2924_v22, 2  ;;  %v768_v2 = vmul.f32 %v2719_v11, %v3095_v1  ;;  %v1514_v31 = vadd.f32 %v1510_v26, %v1505_v45 }
  0xe7   : > { %v3837_v35 = vrot.slane %v3021_v50, 1  ;;  %v1647_v51 = vrot.slane %v1631_v53, 2  ;;  %v725_v16 = vadd.f32 %v2889_v52, %v687_v15  ;;  %v3151_v0 = vsel %vm707_vm1, %v1200_v63, %v1201_v5  ;;  %v2005_v5 = vld [vmem:[%s3722_s8 + $0x58] sm:$0xff]  ;;  %v2004_v15 = vld [vmem:[%s3722_s8 + $0x50] sm:$0xff] }
  0xe8   : > { %v1611_v55 = vsel %vm819_vm2, %v3836_v10, %v3835_v18  ;;  %v1646_v20 = vrot.slane %v1630_v43, 2  ;;  %v3154_v49 = vperm.slane %v3838_v57, 1  ;;  %v769_v22 = vmul.f32 %v2719_v11, %v3134_v54  ;;  %2014 = vmatpush.msrb.mxu0 %v2005_v5  ;;  %v525_v10 = vpop.f32.mrf.mxu0  ;;  %v3191_v5 = vpop.permute.xlu2 %1130 }
  0xe9   : > { %v1574_v9 = vsel %vm707_vm1, %v1572_v59, %v3837_v35  ;;  %v3159_v45 = vsel %vm707_vm1, %v1234_v44, %v1235_v8  ;;  %v1897_v50 = vmul.f32 %v2772_v56, %v1868_v25  ;;  %v1523_v59 = vmul.f32 %v2732_v23, %v3081_v40 }
  0xea   : > { %v1524_v52 = vmul.f32 %v2732_v23, %v1495_v46  ;;  %v1559_v53 = vmul.f32 %v2843_v27, %v1495_v46  ;;  %v1598_v8 = vmul.f32 %v2741_v38, %v1495_v46  ;;  %v785_v63 = vrot.slane %v768_v2, 1  ;;  %2015 = vmatpush.msrb.mxu0 %v2004_v15 }
  0xeb   : > { %v786_v28 = vrot.slane %v769_v22, 1  ;;  %v1551_v26 = vadd.f32 %v2963_v21, %v1514_v31  ;;  %v1648_v4 = vsel %vm819_vm2, %v1646_v20, %v1647_v51  ;;  %v1633_v19 = vmul.f32 %v3118_v39, %v1495_v46 }
  0xec   : > { %v762_v43 = vadd.f32 %v3079_v61, %v725_v16  ;;  %v1558_v6 = vmul.f32 %v2843_v27, %v3081_v40  ;;  %v1597_v44 = vmul.f32 %v2741_v38, %v3081_v40  ;;  %v1036_v18 = vmul.f32 %v2664_v37, %v1012_v17 }
  0xed   : > { %v787_v60 = vsel %vm707_vm1, %v785_v63, %v786_v28  ;;  %v3184_v21 = vmul.f32 %v3154_v49, %v1868_v25  ;;  %v1913_v2 = vrot.slane %v1897_v50, 1  ;;  %v1632_v46 = vmul.f32 %v3118_v39, %v3081_v40 }
  0xee   : > { %v799_v61 = vadd.f32 %v787_v60, %v762_v43  ;;  %v1541_v31 = vrot.slane %v1523_v59, 1  ;;  %v1542_v35 = vrot.slane %v1524_v52, 1  ;;  %v1576_v51 = vrot.slane %v1559_v53, 1 }
  0xef   : > { %v1616_v16 = vrot.slane %v1598_v8, 2  ;;  %v1588_v20 = vadd.f32 %v1574_v9, %v1551_v26  ;;  %v1650_v57 = vrot.slane %v1633_v19, 2  ;;  %v881_v22 = vmul.f32 %v2724_v13, %v3134_v54  ;;  %v1384_v8 = vpop.f32.mrf.mxu2 }
  0xf0   : > { %v548_v17 = vmul.f32 %v2664_v37, %v525_v10  ;;  %v1575_v25 = vrot.slane %v1558_v6, 1  ;;  %v1615_v15 = vrot.slane %v1597_v44, 2  ;;  %v880_v50 = vmul.f32 %v2724_v13, %v3095_v1  ;;  %v1762_v6 = vpop.f32.mrf.mxu3  ;;  %v1015_v44 = vpop.f32.mrf.mxu1 }
  0xf1   : > { %v1048_v63 = vadd.f32 %v2672_v41, %v1036_v18  ;;  %v3839_v59 = vrot.slane %v2944_v34, 1  ;;  %v1649_v9 = vrot.slane %v1632_v46, 2  ;;  %v837_v53 = vadd.f32 %v2893_v30, %v799_v61 }
  0xf2   : > { %v563_v28 = vadd.f32 %v2672_v41, %v548_v17  ;;  %v3204_v26 = vsel %vm707_vm1, %v1541_v31, %v1542_v35  ;;  %v3207_v19 = vsel %vm707_vm1, %v1575_v25, %v1576_v51  ;;  %v3210_v43 = vsel %vm819_vm2, %v1615_v15, %v1616_v16  ;;  %v3845_v15 = vld [vmem:[#allocation5_spill] sm:$0xff] }
  0xf3   : > { %v3199_v52 = vsel %vm707_vm1, %v1913_v2, %v3839_v59  ;;  %3840 = vst [vmem:[#allocation12_spill] sm:$0xff] %v3204_v26  ;;  %v733_v34 = vmul.f32 %v2710_v7, %v3095_v1  ;;  %v1625_v60 = vadd.f32 %v1611_v55, %v1588_v20  ;;  %v3215_v30 = vsel %vm819_vm2, %v1649_v9, %v1650_v57  ;;  %v2002_v59 = vld [vmem:[%s3722_s8 + $0x40] sm:$0xff] }
  0xf4   : > { %3841 = vst [vmem:[#allocation23_spill] sm:$0xff] %v3207_v19  ;;  %v898_v18 = vrot.slane %v881_v22, 2  ;;  %v575_v10 = vmax.f32 %v563_v28, 0.0  ;;  %v897_v2 = vrot.slane %v880_v50, 2  ;;  %v1060_v46 = vmax.f32 %v1048_v63, 0.0  ;;  %v3844_v22 = vld [vmem:[#allocation8_spill] sm:$0xff]  ;;  %v1836_v28 = vpop.permute.xlu1 %1835 }
  0xf5   : > { %3842 = vst [vmem:[#allocation2_spill] sm:$0xff] %v3210_v43  ;;  %v1801_v61 = vmax.f32 %v2976_v58, 0.0  ;;  %v1800_v31 = vmax.f32 %v2896_v48, 0.0  ;;  %v675_v51 = vmul.f32 %v3831_v33, %v3095_v1  ;;  %v874_v16 = vadd.f32 %v3085_v14, %v837_v53  ;;  %v2003_v63 = vld [vmem:[%s3722_s8 + $0x48] sm:$0xff] }
  0xf6   : > { %3843 = vst [vmem:[#allocation25_spill] sm:$0xff] %v3215_v30  ;;  %v587_v35 = vmin.f32 %v575_v10, 6.0  ;;  %v1037_v17 = vmul.f32 %v2664_v37, %v1015_v44  ;;  %v3225_v55 = vmul.f32 %v3816_v62, %v3134_v54  ;;  %v734_v20 = vmul.f32 %v2710_v7, %v3134_v54  ;;  %2016 = vmatpush.msrb.mxu0 %v2003_v63 }
  0xf7   : > { %v3231_v58 = vmul.f32 %v3817_v42, %v3134_v54  ;;  %v3235_v48 = vmul.f32 %v2721_v12, %v3134_v54  ;;  %v1662_v57 = vadd.f32 %v1648_v4, %v1625_v60  ;;  %v899_v14 = vsel %vm819_vm2, %v897_v2, %v898_v18  ;;  %v3254_v2 = vpop.permute.xlu2 %1477 }
  0xf8   : > { %v3239_v25 = vmul.f32 %v3844_v22, %v587_v35  ;;  %v666_v50 = vmul.f32 %v3845_v15, %v2905_v47  ;;  %v1072_v9 = vmin.f32 %v1060_v46, 6.0  ;;  %v1811_v54 = vmin.f32 %v1801_v61, 6.0  ;;  %2017 = vmatpush.msrb.mxu0 %v2002_v59  ;;  %v3846_v35 = vld [vmem:[#allocation4_spill] sm:$0xff] }
  0xf9   : > { %v1810_v53 = vmin.f32 %v1800_v31, 6.0  ;;  %v695_v4 = vmul.f32 %v3816_v62, %v2905_v47  ;;  %v911_v18 = vadd.f32 %v899_v14, %v874_v16  ;;  %v1049_v10 = vadd.f32 %v2672_v41, %v1037_v17  ;;  %v1831_v31 = vpop.permute.xlu0 %1830  ;;  %v1387_v16 = vpop.f32.mrf.mxu2 }
  0xfa   : > { %v679_v44 = vadd.f32 %v675_v51, %v666_v50  ;;  %v684_v60 = vmul.f32 %v2735_v24, %v3239_v25  ;;  %v751_v22 = vrot.slane %v733_v34, 1  ;;  %v752_v46 = vrot.slane %v734_v20, 1  ;;  %v1765_v20 = vpop.f32.mrf.mxu3 }
  0xfb   : > { %v1406_v61 = vmul.f32 %v2664_v37, %v1384_v8  ;;  %v1883_v63 = vadd.f32 %v3184_v21, %v1662_v57  ;;  %v1784_v17 = vmul.f32 %v2664_v37, %v1762_v6  ;;  %v1871_v14 = vmul.f32 %v1836_v28, %v1811_v54 }
  0xfc   : > { %v688_v24 = vadd.f32 %v684_v60, %v679_v44  ;;  %v3263_v30 = vperm.slane %v3824_v36, 3  ;;  %v714_v34 = vrot.slane %v695_v4, 1  ;;  %v3266_v8 = vmul.f32 %v3846_v35, %v1072_v9  ;;  %v3849_v35 = vld [vmem:[#allocation29_spill] sm:$0xff] }
  0xfd   : > { %v1870_v59 = vmul.f32 %v1831_v31, %v1810_v53  ;;  %v1061_v43 = vmax.f32 %v1049_v10, 0.0  ;;  %v1156_v21 = vadd.f32 %v2918_v29, %v911_v18  ;;  %v753_v57 = vsel %vm707_vm1, %v751_v22, %v752_v46  ;;  %v1018_v10 = vpop.f32.mrf.mxu1  ;;  %v3851_v46 = vld [vmem:[#allocation3_spill] sm:$0xff] }
  0xfe   : > { %v3847_v44 = vrot.slane %v3056_v32, 1  ;;  %v770_v6 = vmul.f32 %v2719_v11, %v3239_v25  ;;  %v1407_v54 = vmul.f32 %v2664_v37, %v1387_v16  ;;  %v1416_v4 = vadd.f32 %v2672_v41, %v1406_v61 }
  0xff   : > { %v3278_v9 = vperm.slane %v3824_v36, 1  ;;  %v1785_v28 = vmul.f32 %v2664_v37, %v1765_v20  ;;  %v3282_v29 = vadd.f32 %v2672_v41, %v1784_v17  ;;  %v3285_v32 = vmul.f32 %v2772_v56, %v1871_v14 }
 0x100   : > { %v716_v60 = vsel %vm707_vm1, %v714_v34, %v3847_v44  ;;  %v3288_v18 = vmul.f32 %v3263_v30, %v1871_v14  ;;  %v667_v11 = vmul.f32 %v3845_v15, %v3095_v1  ;;  %v1170_v36 = vmul.f32 %v3849_v35, %v3266_v8  ;;  %v3307_v44 = vpop.permute.xlu2 %1482 }
 0x101   : > { %v726_v53 = vadd.f32 %v716_v60, %v688_v24  ;;  %3848 = vst [vmem:[#allocation10_spill] sm:$0xff] %v3285_v32  ;;  %v3295_v22 = vmul.f32 %v3154_v49, %v1870_v59  ;;  %v1073_v37 = vmin.f32 %v1061_v43, 6.0  ;;  %v1165_v61 = vadd.f32 %v3851_v46, %v1156_v21  ;;  %v3854_v60 = vld [vmem:[#allocation14_spill] sm:$0xff] }
 0x102   : > { %v3299_v31 = vmul.f32 %v2772_v56, %v1870_v59  ;;  %v3302_v24 = vmul.f32 %v3263_v30, %v1870_v59  ;;  %v788_v16 = vrot.slane %v770_v6, 1  ;;  %v1417_v17 = vadd.f32 %v2672_v41, %v1407_v54  ;;  %v3856_v21 = vld [vmem:[#allocation18_spill] sm:$0xff] }
 0x103   : > { %3850 = vst [vmem:[#allocation8_spill] sm:$0xff] %v3295_v22  ;;  %v1888_v15 = vmul.f32 %v3278_v9, %v1870_v59  ;;  %v1795_v14 = vadd.f32 %v2672_v41, %v1785_v28  ;;  %v1426_v34 = vmax.f32 %v1416_v4, 0.0  ;;  %v763_v20 = vadd.f32 %v753_v57, %v726_v53  ;;  %v3855_v59 = vld [vmem:[#allocation30_spill] sm:$0xff] }
 0x104   : > { %3852 = vst [vmem:[#allocation5_spill] sm:$0xff] %v3299_v31  ;;  %v3313_v46 = vmul.f32 %v3854_v60, %v3266_v8  ;;  %v807_v6 = vmul.f32 %v3817_v42, %v2905_v47  ;;  %v676_v41 = vmul.f32 %v3831_v33, %v3239_v25  ;;  %v1145_v57 = vmul.f32 %v3855_v59, %v1073_v37  ;;  %v3858_v32 = vld [vmem:[#allocation22_spill] sm:$0xff]  ;;  %v2001_v33 = vld [vmem:[%s3722_s8 + $0x38] sm:$0xff] }
 0x105   : > { %3853 = vst [vmem:[#allocation4_spill] sm:$0xff] %v3302_v24  ;;  %v3317_v54 = vadd.f32 %v1888_v15, %v1883_v63  ;;  %v1174_v4 = vadd.f32 %v1170_v36, %v1165_v61  ;;  %v1427_v43 = vmax.f32 %v1417_v17, 0.0  ;;  %v3857_v51 = vrot.slane %v3856_v21, 1  ;;  %v2000_v36 = vld [vmem:[%s3722_s8 + $0x30] sm:$0xff]  ;;  %2018 = vmatpush.msrb.mxu0 %v2001_v33  ;;  %v3860_v53 = vld [vmem:[#allocation6_spill] sm:$0xff] }
 0x106   : > { %v1254_v47 = vmul.f32 %v3858_v32, %v3266_v8  ;;  %v1805_v63 = vmax.f32 %v1795_v14, 0.0  ;;  %v1436_v15 = vmin.f32 %v1426_v34, 6.0  ;;  %v3337_v37 = vmul.f32 %v2710_v7, %v3239_v25  ;;  %v3859_v14 = vld [vmem:[#allocation7_spill] sm:$0xff]  ;;  %v3367_v31 = vld [vmem:[%s3718_s4] ss:$0 sm:$0xff] }
 0x107   : > { %v790_v50 = vsel %vm707_vm1, %v788_v16, %v3857_v51  ;;  %v882_v51 = vmul.f32 %v2724_v13, %v3239_v25  ;;  %v1237_v61 = vrot.slane %v3313_v46, 1  ;;  %v1473_v16 = vpop.permute.xlu0 %1472  ;;  %v826_v17 = vrot.slane %v807_v6, 2  ;;  %v3355_v46 = vld [vmem:[%s3717_s3] ss:$0 sm:$0xff]  ;;  %v1021_v6 = vpop.f32.mrf.mxu1  ;;  %2019 = vmatpush.msrb.mxu0 %v2000_v36 }
 0x108   : > { %v800_v22 = vadd.f32 %v790_v50, %v763_v20  ;;  %v3342_v50 = vadd.f32 %v676_v41, %v667_v11  ;;  %v1211_v34 = vadd.f32 %v3859_v14, %v1174_v4  ;;  %v1220_v20 = vmul.f32 %v3854_v60, %v1145_v57  ;;  %v3862_v41 = vld [vmem:[#allocation9_spill] sm:$0xff] }
 0x109   : > { %v1255_v21 = vmul.f32 %v3858_v32, %v1145_v57  ;;  %v1437_v59 = vmin.f32 %v1427_v43, 6.0  ;;  %v3861_v7 = vrot.slane %v3860_v53, 2  ;;  %v845_v13 = vmul.f32 %v2721_v12, %v3095_v1 }
 0x10a   : > { %v1038_v11 = vmul.f32 %v3355_v46, %v1018_v10  ;;  %v3359_v4 = vmul.f32 %v3862_v41, %v1145_v57  ;;  %v1815_v43 = vmin.f32 %v1805_v63, 6.0  ;;  %v3361_v33 = vmul.f32 %v1473_v16, %v1436_v15  ;;  %v1856_v15 = vpop.permute.xlu2 %1855 }
 0x10b   : > { %v828_v28 = vsel %vm819_vm2, %v826_v17, %v3861_v7  ;;  %v900_v14 = vrot.slane %v882_v51, 2  ;;  %v863_v7 = vrot.slane %v845_v13, 2  ;;  %v1248_v36 = vadd.f32 %v3159_v45, %v1211_v34  ;;  %v1390_v17 = vpop.f32.mrf.mxu2  ;;  %v3867_v45 = vld [vmem:[#allocation21_spill] sm:$0xff] }
 0x10c   : > { %3863 = vst [vmem:[#allocation29_spill] sm:$0xff] %v3359_v4  ;;  %v838_v53 = vadd.f32 %v828_v28, %v800_v22  ;;  %v1050_v10 = vadd.f32 %v3367_v31, %v1038_v11  ;;  %v1271_v19 = vrot.slane %v1254_v47, 1  ;;  %v1272_v57 = vrot.slane %v1255_v21, 1  ;;  %v3379_v11 = vpop.permute.xlu1 %1135 }
 0x10d   : > { %v1039_v63 = vmul.f32 %v3355_v46, %v1021_v6  ;;  %v1238_v16 = vrot.slane %v1220_v20, 1  ;;  %v1497_v22 = vmul.f32 %v3254_v2, %v1437_v59  ;;  %v3864_v28 = vrot.slane %v3235_v48, 2  ;;  %3866 = vst [vmem:[#allocation14_spill] sm:$0xff] %v3379_v11  ;;  %v3869_v48 = vld [vmem:[#allocation20_spill] sm:$0xff] }
 0x10e   : > { %v1062_v13 = vmax.f32 %v1050_v10, 0.0  ;;  %v3377_v24 = vmul.f32 %v1856_v15, %v1815_v43  ;;  %v3383_v47 = vmul.f32 %v3867_v45, %v3361_v33  ;;  %v3387_v2 = vmul.f32 %v2732_v23, %v3361_v33  ;;  %v3871_v10 = vld [vmem:[#allocation35_spill] sm:$0xff] }
 0x10f   : > { %v865_v51 = vsel %vm819_vm2, %v863_v7, %v3864_v28  ;;  %v3870_v20 = vrot.slane %v3869_v48, 2  ;;  %v1051_v6 = vadd.f32 %v3367_v31, %v1039_v63  ;;  %v1273_v43 = vsel %vm707_vm1, %v1271_v19, %v1272_v57  ;;  %v3872_v15 = vld [vmem:[#allocation11_spill] sm:$0xff]  ;;  %v3874_v48 = vld [vmem:[#allocation37_spill] sm:$0xff]  ;;  %v1998_v19 = vld [vmem:[%s3722_s8 + $0x20] sm:$0xff] }
 0x110   : > { %3865 = vst [vmem:[#allocation3_spill] sm:$0xff] %v3377_v24  ;;  %v875_v34 = vadd.f32 %v865_v51, %v838_v53  ;;  %v1074_v59 = vmin.f32 %v1062_v13, 6.0  ;;  %v1153_v28 = vmul.f32 %v3872_v15, %v3871_v10  ;;  %v1408_v26 = vmul.f32 %v3355_v46, %v1390_v17 }
 0x111   : > { %3868 = vst [vmem:[#allocation30_spill] sm:$0xff] %v3387_v2  ;;  %v902_v21 = vsel %vm819_vm2, %v900_v14, %v3870_v20  ;;  %v1239_v53 = vsel %vm707_vm1, %v1237_v61, %v1238_v16  ;;  %v1285_v51 = vadd.f32 %v1273_v43, %v1248_v36  ;;  %v3399_v11 = vmul.f32 %v2732_v23, %v1497_v22  ;;  %v1999_v14 = vld [vmem:[%s3722_s8 + $0x28] sm:$0xff]  ;;  %v3876_v23 = vld [vmem:[#allocation13_spill] sm:$0xff]  ;;  %v1841_v2 = vpop.permute.xlu0 %1840 }
 0x112   : > { %v912_v7 = vadd.f32 %v902_v21, %v875_v34  ;;  %v3402_v4 = vmul.f32 %v3874_v48, %v1074_v59  ;;  %v3411_v57 = vmul.f32 %v2843_v27, %v1497_v22  ;;  %v3414_v61 = vmul.f32 %v2741_v38, %v1497_v22  ;;  %2020 = vmatpush.msrb.mxu0 %v1999_v14 }
 0x113   : > { %3873 = vst [vmem:[#allocation18_spill] sm:$0xff] %v3399_v11  ;;  %v1162_v36 = vmul.f32 %v3876_v23, %v3266_v8  ;;  %v3419_v63 = vmul.f32 %v3118_v39, %v1497_v22  ;;  %v3423_v16 = vmul.f32 %v2843_v27, %v3361_v33  ;;  %v1803_v13 = vmax.f32 %v3137_v3, 0.0  ;;  %v3878_v22 = vld [vmem:[#allocation33_spill] sm:$0xff] }
 0x114   : > { %3875 = vst [vmem:[#allocation22_spill] sm:$0xff] %v3414_v61  ;;  %v1157_v17 = vadd.f32 %v1153_v28, %v912_v7  ;;  %v1063_v34 = vmax.f32 %v1051_v6, 0.0  ;;  %v3428_v20 = vmul.f32 %v3263_v30, %v3377_v24  ;;  %v1171_v59 = vmul.f32 %v3849_v35, %v3402_v4  ;;  %2021 = vmatpush.msrb.mxu0 %v1998_v19  ;;  %v1024_v28 = vpop.f32.mrf.mxu1 }
 0x115   : > { %v1418_v43 = vadd.f32 %v3367_v31, %v1408_v26  ;;  %v1506_v7 = vadd.f32 %v3878_v22, %v1285_v51  ;;  %v3438_v3 = vmul.f32 %v2741_v38, %v3361_v33  ;;  %v3446_v51 = vmul.f32 %v3118_v39, %v3361_v33  ;;  %v1846_v38 = vpop.permute.xlu1 %1845  ;;  %v3881_v26 = vld [vmem:[#allocation26_spill] sm:$0xff]  ;;  %v1995_v39 = vld [vmem:[%s3722_s8 + $0x8] sm:$0xff] }
 0x116   : > { %3877 = vst [vmem:[#allocation7_spill] sm:$0xff] %v3428_v20  ;;  %v1166_v21 = vadd.f32 %v1162_v36, %v1157_v17  ;;  %v3880_v17 = vld [vmem:[#allocation38_spill] sm:$0xff]  ;;  %v1813_v19 = vmin.f32 %v1803_v13, 6.0  ;;  %v1075_v22 = vmin.f32 %v1063_v34, 6.0  ;;  %v697_v48 = vmul.f32 %v3816_v62, %v3095_v1  ;;  %v3882_v13 = vld [vmem:[#allocation24_spill] sm:$0xff] }
 0x117   : > { %3879 = vst [vmem:[#allocation6_spill] sm:$0xff] %v3438_v3  ;;  %v1802_v36 = vmax.f32 %v3880_v17, 0.0  ;;  %v1428_v10 = vmax.f32 %v1418_v43, 0.0  ;;  %v1768_v17 = vpop.f32.mrf.mxu3  ;;  %v689_v34 = vadd.f32 %v3882_v13, %v3342_v50  ;;  %v3883_v43 = vld [vmem:[#allocation39_spill] sm:$0xff]  ;;  %v1997_v50 = vld [vmem:[%s3722_s8 + $0x18] sm:$0xff]  ;;  %v3884_v13 = vrot.slane %v3225_v55, 1 }
 0x118   : > { %v1175_v14 = vadd.f32 %v1171_v59, %v1166_v21  ;;  %v1256_v59 = vmul.f32 %v3858_v32, %v3402_v4  ;;  %v3456_v6 = vmul.f32 %v3881_v26, %v1075_v22  ;;  %v3461_v61 = vadd.f32 %v3883_v43, %v1506_v7  ;;  %v1393_v22 = vpop.f32.mrf.mxu2  ;;  %v1996_v7 = vld [vmem:[%s3722_s8 + $0x10] sm:$0xff]  ;;  %2022 = vmatpush.msrb.mxu0 %v1997_v50  ;;  %v3889_v50 = vld [vmem:[#allocation27_spill] sm:$0xff] }
 0x119   : > { %v717_v62 = vrot.slane %v697_v48, 1  ;;  %v1873_v20 = vmul.f32 %v1846_v38, %v1813_v19  ;;  %v1786_v11 = vmul.f32 %v3355_v46, %v1768_v17  ;;  %v809_v38 = vmul.f32 %v3817_v42, %v3095_v1 }
 0x11a   : > { %v1212_v24 = vadd.f32 %v3151_v0, %v1175_v14  ;;  %v1812_v14 = vmin.f32 %v1802_v36, 6.0  ;;  %v1257_v26 = vmul.f32 %v3858_v32, %v3456_v6  ;;  %v1438_v36 = vmin.f32 %v1428_v10, 6.0  ;;  %v3885_v0 = vld [vmem:[#allocation15_spill] sm:$0xff]  ;;  %2023 = vmatpush.msrb.mxu0 %v1996_v7 }
 0x11b   : > { %v719_v19 = vsel %vm707_vm1, %v717_v62, %v3884_v13  ;;  %v1274_v17 = vrot.slane %v1256_v59, 1  ;;  %v1503_v21 = vmul.f32 %v3885_v0, %v3081_v40  ;;  %v1409_v55 = vmul.f32 %v3355_v46, %v1393_v22 }
 0x11c   : > { %v1249_v48 = vadd.f32 %v1239_v53, %v1212_v24  ;;  %v1275_v43 = vrot.slane %v1257_v26, 1  ;;  %v727_v3 = vadd.f32 %v719_v19, %v689_v34  ;;  %v3484_v10 = vmul.f32 %v1841_v2, %v1812_v14  ;;  %v3886_v24 = vld [vmem:[#allocation17_spill] sm:$0xff]  ;;  %v1994_v14 = vld [vmem:[%s3722_s8] sm:$0xff]  ;;  %2024 = vmatpush.msrb.mxu0 %v1995_v39 }
 0x11d   : > { %v3887_v53 = vrot.slane %v3886_v24, 1  ;;  %v3888_v62 = vrot.slane %v3337_v37, 1  ;;  %v847_v1 = vmul.f32 %v2721_v12, %v3239_v25  ;;  %v3495_v40 = vmul.f32 %v2772_v56, %v1873_v20  ;;  %v3891_v24 = vld [vmem:[#allocation19_spill] sm:$0xff] }
 0x11e   : > { %v3498_v59 = vadd.f32 %v3367_v31, %v1786_v11  ;;  %v1276_v2 = vsel %vm707_vm1, %v1274_v17, %v1275_v43  ;;  %v3505_v37 = vmul.f32 %v3307_v44, %v1438_v36  ;;  %v829_v22 = vrot.slane %v809_v38, 2  ;;  %2025 = vmatpush.msrb.mxu0 %v1994_v14  ;;  %v1027_v17 = vpop.f32.mrf.mxu1 }
 0x11f   : > { %v756_v42 = vsel %vm707_vm1, %v3888_v62, %v3887_v53  ;;  %v1286_v26 = vadd.f32 %v1276_v2, %v1249_v48  ;;  %v866_v12 = vrot.slane %v847_v1, 2  ;;  %v3509_v25 = vmul.f32 %v3854_v60, %v3402_v4 }
 0x120   : > { %v764_v34 = vadd.f32 %v756_v42, %v727_v3  ;;  %v1804_v11 = vmax.f32 %v3282_v29, 0.0  ;;  %v1040_v3 = vmul.f32 %v3355_v46, %v1024_v28  ;;  %v3515_v13 = vmul.f32 %v3263_v30, %v1873_v20  ;;  %v1771_v20 = vpop.f32.mrf.mxu3 }
 0x121   : > { %v3519_v44 = vmul.f32 %v3154_v49, %v3484_v10  ;;  %v1419_v36 = vadd.f32 %v3367_v31, %v1409_v55  ;;  %v3890_v39 = vrot.slane %v3231_v58, 2  ;;  %v3527_v29 = vmul.f32 %v3278_v9, %v3484_v10 }
 0x122   : > { %v801_v7 = vadd.f32 %v3889_v50, %v764_v34  ;;  %v3531_v28 = vmul.f32 %v2772_v56, %v3484_v10  ;;  %v1052_v38 = vadd.f32 %v3367_v31, %v1040_v3  ;;  %v3536_v43 = vmul.f32 %v3867_v45, %v3505_v37 }
 0x123   : > { %v831_v48 = vsel %vm819_vm2, %v829_v22, %v3890_v39  ;;  %v1920_v58 = vrot.slane %v3495_v40, 1  ;;  %v1507_v55 = vadd.f32 %v1503_v21, %v1286_v26  ;;  %v3892_v53 = vrot.slane %v3891_v24, 2  ;;  %v3893_v21 = vld [vmem:[#allocation28_spill] sm:$0xff] }
 0x124   : > { %v839_v19 = vadd.f32 %v831_v48, %v801_v7  ;;  %v1240_v42 = vrot.slane %v3509_v25, 1  ;;  %v3545_v1 = vmul.f32 %v2843_v27, %v3505_v37  ;;  %v1064_v34 = vmax.f32 %v1052_v38, 0.0  ;;  %v1851_v7 = vpop.permute.xlu1 %1850  ;;  %v3563_v48 = vld [vmem:[%s3720_s6] ss:$0 sm:$0xff] }
 0x125   : > { %v868_v62 = vsel %vm819_vm2, %v866_v12, %v3892_v53  ;;  %v1814_v14 = vmin.f32 %v1804_v11, 6.0  ;;  %v1429_v22 = vmax.f32 %v1419_v36, 0.0  ;;  %v1787_v45 = vmul.f32 %v3355_v46, %v1771_v20 }
 0x126   : > { %v876_v2 = vadd.f32 %v868_v62, %v839_v19  ;;  %v1041_v50 = vmul.f32 %v3355_v46, %v1027_v17  ;;  %v1076_v3 = vmin.f32 %v1064_v34, 6.0  ;;  %v1154_v12 = vmul.f32 %v3872_v15, %v3266_v8 }
 0x127   : > { %v1184_v25 = vmul.f32 %v3862_v41, %v3266_v8  ;;  %v1222_v39 = vmul.f32 %v3854_v60, %v3456_v6  ;;  %v1516_v11 = vadd.f32 %v3383_v47, %v1507_v55  ;;  %v1929_v46 = vadd.f32 %v3199_v52, %v3317_v54  ;;  %v3895_v41 = vld [vmem:[#allocation4_spill] sm:$0xff] }
 0x128   : > { %v913_v26 = vadd.f32 %v3893_v21, %v876_v2  ;;  %v1053_v36 = vadd.f32 %v3367_v31, %v1041_v50  ;;  %v1148_v15 = vmul.f32 %v3191_v5, %v1076_v3  ;;  %v1163_v8 = vmul.f32 %v3876_v23, %v3402_v4  ;;  %v3579_v5 = vld [vmem:[%s3721_s7] ss:$0 sm:$0xff]  ;;  %v3897_v55 = vld [vmem:[#allocation12_spill] sm:$0xff] }
 0x129   : > { %v3894_v60 = vrot.slane %v3288_v18, 1  ;;  %v3896_v47 = vrot.slane %v3895_v41, 1  ;;  %v1954_v19 = vrot.slane %v3515_v13, 1  ;;  %v3574_v52 = vmul.f32 %v1851_v7, %v1814_v14  ;;  %v3898_v2 = vld [vmem:[#allocation34_spill] sm:$0xff]  ;;  %v3900_v14 = vld [vmem:[#allocation31_spill] sm:$0xff] }
 0x12a   : > { %v1158_v20 = vadd.f32 %v1154_v12, %v913_v26  ;;  %v1065_v54 = vmax.f32 %v1053_v36, 0.0  ;;  %v1439_v4 = vmin.f32 %v1429_v22, 6.0  ;;  %v1172_v18 = vmul.f32 %v3849_v35, %v1148_v15  ;;  %v2237_v12 = vld [vmem:[%s2516_s25 + $0x190] sm:$0xff]  ;;  %v3902_v36 = vld [vmem:[#allocation29_spill] sm:$0xff] }
 0x12b   : > { %v1952_v6 = vsel %vm707_vm1, %v3896_v47, %v3894_v60  ;;  %v1203_v17 = vrot.slane %v1184_v25, 1  ;;  %v1553_v24 = vadd.f32 %v3897_v55, %v1516_v11  ;;  %v3899_v34 = vrot.slane %v3898_v2, 1  ;;  %v2273_v35 = vld [vmem:[%s2516_s25 + $0x230] sm:$0xff]  ;;  %v1488_v25 = vpop.permute.xlu0 %1487  ;;  %2260 = vmatmul.msk.f32.gmra.mxu2 %vm447_vm0, %v2237_v12  ;;  %v3913_v12 = vld [vmem:[#allocation25_spill] sm:$0xff] }
 0x12c   : > { %v1966_v38 = vadd.f32 %v1952_v6, %v1929_v46  ;;  %v1167_v23 = vadd.f32 %v1163_v8, %v1158_v20  ;;  %v1077_v53 = vmin.f32 %v1065_v54, 6.0  ;;  %v3901_v50 = vrot.slane %v3900_v14, 1  ;;  %v3904_v8 = vld [vmem:[#allocation14_spill] sm:$0xff]  ;;  %2296 = vmatmul.msk.f32.gmra.mxu3 %vm447_vm0, %v2273_v35 }
 0x12d   : > { %v1241_v21 = vrot.slane %v1222_v39, 1  ;;  %v1797_v26 = vadd.f32 %v3367_v31, %v1787_v45  ;;  %v3903_v11 = vrot.slane %v3902_v36, 1  ;;  %v1258_v20 = vmul.f32 %v3858_v32, %v1148_v15  ;;  %v3905_v45 = vld [vmem:[#allocation23_spill] sm:$0xff] }
 0x12e   : > { %v1974_v62 = vmul.f32 %v3563_v48, %v1966_v38  ;;  %v1540_v7 = vsel %vm707_vm1, %v3901_v50, %v3899_v34  ;;  %v1176_v3 = vadd.f32 %v1172_v18, %v1167_v23  ;;  %v1149_v60 = vmul.f32 %v3904_v8, %v1077_v53  ;;  %v3908_v23 = vld [vmem:[#allocation36_spill] sm:$0xff]  ;;  %v3912_v50 = vld [vmem:[#allocation2_spill] sm:$0xff] }
 0x12f   : > { %v1552_v22 = vadd.f32 %v1540_v7, %v3461_v61  ;;  %v1205_v46 = vsel %vm707_vm1, %v1203_v17, %v3903_v11  ;;  %v1499_v39 = vmul.f32 %v1488_v25, %v1439_v4  ;;  %v3906_v61 = vrot.slane %v3411_v57, 1  ;;  %v3910_v17 = vld [vmem:[#allocation32_spill] sm:$0xff] }
 0x130   : > { %v1982_v41 = vadd.f32 %v3579_v5, %v1974_v62  ;;  %v1213_v31 = vadd.f32 %v1205_v46, %v1176_v3  ;;  %v3907_v6 = vrot.slane %v3423_v16, 1  ;;  %v1259_v15 = vmul.f32 %v3858_v32, %v1149_v60 }
 0x131   : > { %v1589_v47 = vadd.f32 %v3905_v45, %v1552_v22  ;;  %v3909_v18 = vrot.slane %v3908_v23, 2  ;;  %v3911_v55 = vrot.slane %v3910_v17, 2  ;;  %v1936_v57 = vmul.f32 %v3263_v30, %v3484_v10 }
 0x132   : > { %v1580_v54 = vsel %vm707_vm1, %v3907_v6, %v3906_v61  ;;  %v1986_v38 = vmax.f32 %v1982_v41, 0.0  ;;  %v1242_v16 = vsel %vm707_vm1, %v1240_v42, %v1241_v21  ;;  %v1938_v62 = vmul.f32 %v3263_v30, %v3574_v52  ;;  %v2238_v21 = vld [vmem:[%s2516_s25 + $0x198] sm:$0xff] }
 0x133   : > { %v1614_v4 = vsel %vm819_vm2, %v3911_v55, %v3909_v18  ;;  %v1590_v53 = vadd.f32 %v1580_v54, %v1553_v24  ;;  %v1277_v32 = vrot.slane %v1258_v20, 1  ;;  %v1278_v34 = vrot.slane %v1259_v15, 1  ;;  %v2274_v20 = vld [vmem:[%s2516_s25 + $0x238] sm:$0xff]  ;;  %2261 = vmatmul.msk.f32.gmra.mxu2 %vm447_vm0, %v2238_v21  ;;  %v3918_v54 = vld [vmem:[#allocation10_spill] sm:$0xff]  ;;  %v1866_v55 = vpop.permute.xlu1 %1865  ;;  %s2171_s25 = sshll.u32 %s2382_s17, 2 }
 0x134   : > { %v1626_v2 = vadd.f32 %v1614_v4, %v1589_v47  ;;  %v1990_v14 = vmin.f32 %v1986_v38, 6.0  ;;  %v1563_v3 = vmul.f32 %v2843_v27, %v1499_v39  ;;  %v1250_v22 = vadd.f32 %v1242_v16, %v1213_v31  ;;  %v3917_v47 = vld [vmem:[#allocation16_spill] sm:$0xff]  ;;  %2297 = vmatmul.msk.f32.gmra.mxu3 %vm447_vm0, %v2274_v20  ;;  %v3920_v38 = vld [vmem:[#allocation5_spill] sm:$0xff]  ;;  %v1861_v4 = vpop.permute.xlu0 %1860  ;;  %v3922_v16 = vld [vmem:[#allocation18_spill] sm:$0xff]  ;;  %p403_p6 = scmp.lt.s32.totalorder %s2171_s25, 7 }
 0x135   : > { %v1627_v7 = vadd.f32 %v3912_v50, %v1590_v53  ;;  %v3914_v35 = vrot.slane %v3419_v63, 2  ;;  %v3915_v10 = vrot.slane %v3446_v51, 2  ;;  %v1807_v25 = vmax.f32 %v1797_v26, 0.0  ;;  %v3916_v63 = vld [vmem:[#allocation8_spill] sm:$0xff]  ;;  %v3928_v21 = vld [vmem:[#allocation22_spill] sm:$0xff] }
 0x136   : > { %v1663_v24 = vadd.f32 %v3913_v12, %v1626_v2  ;;  %v1806_v36 = vmax.f32 %v3498_v59, 0.0  ;;  %v1279_v11 = vsel %vm707_vm1, %v1277_v32, %v1278_v34  ;;  %2026 = vmatmul.f32.vlgmr.msrb.gmra.mxu0 %v1990_v14  ;;  %v1919_v27 = vrot.slane %v3531_v28, 1  ;;  %v3924_v2 = vld [vmem:[#allocation30_spill] sm:$0xff]  ;;  %s3946_s25 = smov (!%p403_p6, %s2171_s25), 7 }
 0x137   : > { %v1654_v42 = vsel %vm819_vm2, %v3915_v10, %v3914_v35  ;;  %v1287_v8 = vadd.f32 %v1279_v11, %v1250_v22  ;;  %v1504_v60 = vmul.f32 %v3885_v0, %v3361_v33  ;;  %v1953_v51 = vrot.slane %v1936_v57, 1  ;;  %s406_s24 = sadd.s32 %s2172_s16, %s3946_s25 }
 0x138   : > { %v1664_v46 = vadd.f32 %v1654_v42, %v1627_v7  ;;  %v1884_v41 = vadd.f32 %v3916_v63, %v1663_v24  ;;  %v1890_v31 = vmul.f32 %v3278_v9, %v3574_v52  ;;  %v1956_v26 = vrot.slane %v1938_v62, 1  ;;  %s2173_s28 = sshll.u32 %s406_s24, 3 }
 0x139   : > { %v1582_v45 = vrot.slane %v1563_v3, 1  ;;  %v1637_v61 = vmul.f32 %v3917_v47, %v1499_v39  ;;  %v1508_v6 = vadd.f32 %v1504_v60, %v1287_v8  ;;  %v1817_v33 = vmin.f32 %v1807_v25, 6.0  ;;  %v3926_v3 = vld [vmem:[#allocation7_spill] sm:$0xff]  ;;  %s408_s17 = scalar_lea.vmem %s3725_s11, %s2173_s28 }
 0x13a   : > { %v1885_v59 = vadd.f32 %v3519_v44, %v1664_v46  ;;  %v1893_v28 = vadd.f32 %v3527_v29, %v1884_v41  ;;  %v1816_v0 = vmin.f32 %v1806_v36, 6.0  ;;  %v3919_v15 = vrot.slane %v3918_v54, 1  ;;  %v3930_v36 = vld [vmem:[#allocation6_spill] sm:$0xff]  ;;  %v3932_v8 = vld [vmem:[#allocation3_spill] sm:$0xff] }
 0x13b   : > { %v3921_v23 = vrot.slane %v3920_v38, 1  ;;  %v1636_v44 = vmul.f32 %v3917_v47, %v3505_v37  ;;  %v1517_v39 = vadd.f32 %v3536_v43, %v1508_v6  ;;  %v1921_v29 = vsel %vm707_vm1, %v1919_v27, %v1920_v58 }
 0x13c   : > { %v1894_v17 = vadd.f32 %v1890_v31, %v1885_v59  ;;  %v1581_v57 = vrot.slane %v3545_v1, 1  ;;  %v3923_v62 = vrot.slane %v3922_v16, 1  ;;  %v3925_v32 = vrot.slane %v3924_v2, 1 }
 0x13d   : > { %v1918_v18 = vsel %vm707_vm1, %v3921_v23, %v3919_v15  ;;  %v1955_v37 = vsel %vm707_vm1, %v1953_v51, %v1954_v19  ;;  %v1656_v50 = vrot.slane %v1637_v61, 2  ;;  %v3927_v40 = vrot.slane %v3926_v3, 1 }
 0x13e   : > { %v1930_v53 = vadd.f32 %v1918_v18, %v1893_v28  ;;  %v1546_v34 = vsel %vm707_vm1, %v3925_v32, %v3923_v62  ;;  %v1931_v14 = vadd.f32 %v1921_v29, %v1894_v17  ;;  %v1583_v1 = vsel %vm707_vm1, %v1581_v57, %v1582_v45 }
 0x13f   : > { %v1554_v43 = vadd.f32 %v1546_v34, %v1517_v39  ;;  %v1958_v58 = vsel %vm707_vm1, %v1956_v26, %v3927_v40  ;;  %v1877_v22 = vmul.f32 %v1866_v55, %v1817_v33  ;;  %v1876_v12 = vmul.f32 %v1861_v4, %v1816_v0  ;;  %v2356_v55 = vld [vmem:[%s3723_s9] ss:$0 sm:$0xff] }
 0x140   : > { %v1967_v7 = vadd.f32 %v1955_v37, %v1930_v53  ;;  %v1968_v24 = vadd.f32 %v1958_v58, %v1931_v14  ;;  %v1655_v42 = vrot.slane %v1636_v44, 2  ;;  %v1903_v13 = vmul.f32 %v2772_v56, %v3574_v52 }
 0x141   : > { %v1591_v10 = vadd.f32 %v1583_v1, %v1554_v43  ;;  %v3929_v25 = vrot.slane %v3928_v21, 2  ;;  %v3931_v11 = vrot.slane %v3930_v36, 2  ;;  %v1904_v60 = vmul.f32 %v2772_v56, %v3932_v8 }
 0x142   : > { %v1975_v35 = vmul.f32 %v3563_v48, %v1967_v7  ;;  %v1976_v19 = vmul.f32 %v3563_v48, %v1968_v24  ;;  %v1657_v63 = vsel %vm819_vm2, %v1655_v42, %v1656_v50  ;;  %v1941_v41 = vmul.f32 %v3263_v30, %v1877_v22 }
 0x143   : > { %v1620_v46 = vsel %vm819_vm2, %v3931_v11, %v3929_v25  ;;  %v1940_v51 = vmul.f32 %v3263_v30, %v1876_v12  ;;  %v1882_v31 = vmul.f32 %v3154_v49, %v3574_v52  ;;  %v1922_v47 = vrot.slane %v1903_v13, 1 }
 0x144   : > { %v1983_v20 = vadd.f32 %v3579_v5, %v1975_v35  ;;  %v1628_v27 = vadd.f32 %v1620_v46, %v1591_v10  ;;  %v1984_v59 = vadd.f32 %v3579_v5, %v1976_v19  ;;  %v1891_v61 = vmul.f32 %v3278_v9, %v1876_v12 }
 0x145   : > { %v1923_v33 = vrot.slane %v1904_v60, 1  ;;  %v1960_v56 = vrot.slane %v1941_v41, 1  ;;  %v1959_v0 = vrot.slane %v1940_v51, 1 }
 0x146   : > { %v1987_v26 = vmax.f32 %v1983_v20, 0.0  ;;  %v1665_v45 = vadd.f32 %v1657_v63, %v1628_v27  ;;  %v1988_v54 = vmax.f32 %v1984_v59, 0.0 }
 0x147   : > { %v1924_v15 = vsel %vm707_vm1, %v1922_v47, %v1923_v33  ;;  %v1961_v52 = vsel %vm707_vm1, %v1959_v0, %v1960_v56 }
 0x148   : > { %v1991_v6 = vmin.f32 %v1987_v26, 6.0  ;;  %v1886_v28 = vadd.f32 %v1882_v31, %v1665_v45  ;;  %v1992_v38 = vmin.f32 %v1988_v54, 6.0 }
 0x14a   : > { %2029 = vmatmul.f32.gmra.mxu0 %v1991_v6  ;;  %v1895_v30 = vadd.f32 %v1891_v61, %v1886_v28 }
 0x14c   : > { %v1932_v49 = vadd.f32 %v1924_v15, %v1895_v30 }
 0x14e   : > { %v1969_v23 = vadd.f32 %v1961_v52, %v1932_v49 }
 0x150   : > { %v1977_v18 = vmul.f32 %v3563_v48, %v1969_v23  ;;  %v2357_v48 = vld [vmem:[%s3724_s10] ss:$0 sm:$0xff] }
 0x152   : > { %2032 = vmatmul.f32.gmra.mxu0 %v1992_v38  ;;  %v1985_v9 = vadd.f32 %v3579_v5, %v1977_v18 }
 0x154   : > { %v1989_v17 = vmax.f32 %v1985_v9, 0.0 }
 0x156   : > { %v1993_v44 = vmin.f32 %v1989_v17, 6.0 }
 0x15a   : > { %2035 = vmatmul.f32.gmra.mxu0 %v1993_v44 }
 0x1ae   : > { %v1396_v39 = vpop.f32.mrf.mxu2 }
 0x1af   : > { %v1774_v53 = vpop.f32.mrf.mxu3 }
 0x1b3   : > { %v2027_v4 = vpop.f32.mrf.mxu0 }
 0x1b4   : > { %v2043_v5 = vmul.f32 %v2356_v55, %v2027_v4 }
 0x1b6   : > { %v2051_v29 = vadd.f32 %v2357_v48, %v2043_v5  ;;  %v1398_v57 = vpop.f32.mrf.mxu2 }
 0x1b7   : > { %v1776_v16 = vpop.f32.mrf.mxu3 }
 0x1b8   : > { %2055 = vst [vmem:[%s408_s17] sm:$0xff] %v2051_v29 }
 0x1c7   : > { %v2030_v62 = vpop.f32.mrf.mxu0 }
 0x1c8   : > { %v2044_v2 = vmul.f32 %v2356_v55, %v2030_v62 }
 0x1ca   : > { %v2052_v32 = vadd.f32 %v2357_v48, %v2044_v2 }
 0x1cc   : > { %2056 = vst [vmem:[%s408_s17 + $0x8] sm:$0xff] %v2052_v32 }
 0x1cf   : > { %v2033_v34 = vpop.f32.mrf.mxu0 }
 0x1d0   : > { %v2045_v37 = vmul.f32 %v2356_v55, %v2033_v34 }
 0x1d2   : > { %v2053_v14 = vadd.f32 %v2357_v48, %v2045_v37 }
 0x1d4   : > { %2057 = vst [vmem:[%s408_s17 + $0x10] sm:$0xff] %v2053_v14 }
 0x1d7   : > { %v2036_v50 = vpop.f32.mrf.mxu0 }
 0x1d8   : > { %v2046_v43 = vmul.f32 %v2356_v55, %v2036_v50 }
 0x1da   : > { %v2054_v7 = vadd.f32 %v2357_v48, %v2046_v43 }
 0x1dc   : > { %2058 = vst [vmem:[%s408_s17 + $0x18] sm:$0xff] %v2054_v7 }
 0x1dd PF: > { %s21_s21 = sadd.s32 1, %s2398_s21   ;;  %s3933_s17 = smov %s2390_s19 }
 0x1de   : > { %p18_p7 = scmp.ge.s32.totalorder %s21_s21, 6   ;;  %s3934_s18 = smov %s2394_s20 }
 0x1df   : > { %s3935_s19 = smov %s3938_s22  ;;  %s3936_s20 = smov %s3942_s23 }
 0x1e0   :  { %20 = sbr.rel (!%p18_p7) target bundleno = 3 (0x3), region = 102 }

</bundles_post_ra>
